<compile_context>
chip_gen: v6e
topology: v6e:2x2x1
jax: 0.10.0
libtpu: 0.0.40
codegen_flags: <defaults>
</compile_context>

<pallas_src>
import jax
import jax.numpy as jnp
from jax.experimental import pallas as pl
from jax.experimental.pallas import tpu as pltpu

H = 128   # hidden_size (small, lane-aligned; real module uses 1028 -> pad to 1152)
V = 16    # synthetic vocab size (real module: len(eng_vocab.word2index))
T = 8     # sequence length handled in one kernel launch (T=1 == original forward)


def encoder_gru_kernel(tok_ref, emb_ref, w_ih_ref, w_hh_ref,
                       b_ih_ref, b_hh_ref, h0_ref, out_ref):
    seq_len, hid = out_ref.shape
    vocab = emb_ref.shape[0]

    # ---- Phase 1: batched embedding gather + input-side projection ---------
    # One-hot gather runs on the MXU (exact selection of bf16 rows); the whole
    # input projection for all T steps is ONE (T,H)x(H,3H) dot with b_ih folded
    # in, so the recurrent loop below only carries the hidden-side dot.
    tok = tok_ref[...]                                                # (T, 1) int32
    onehot = (jax.lax.broadcasted_iota(jnp.int32, (seq_len, vocab), 1)
              == tok).astype(jnp.bfloat16)                            # (T, V)
    x_all = jnp.dot(onehot, emb_ref[...],
                    preferred_element_type=jnp.float32)               # (T, H) == emb rows
    gi_all = jnp.dot(x_all.astype(jnp.bfloat16), w_ih_ref[...],
                     preferred_element_type=jnp.float32) + b_ih_ref[...]  # (T, 3H) f32

    # ---- Phase 2: recurrence — one (1,H)x(H,3H) MXU dot per step -----------
    w_hh = w_hh_ref[...]                                              # (H, 3H) bf16, loaded once
    b_hh = b_hh_ref[...]                                              # (1, 3H) f32
    h = h0_ref[...]                                                   # (1, H)  f32

    # Static Python loop == fully-unrolled fori_loop at this small T (full LLO
    # visibility); all slices are static so no scratch / dynamic stores needed.
    # TODO(synk): for long sequences switch to lax.fori_loop(..., unroll=True)
    # with gi_all staged in a VMEM scratch and per-row out_ref stores.
    hs = []
    for t in range(seq_len):
        gi = gi_all[t:t + 1, :]                                       # (1, 3H) static slice
        gh = jnp.dot(h.astype(jnp.bfloat16), w_hh,
                     preferred_element_type=jnp.float32) + b_hh       # (1, 3H)
        r = jax.nn.sigmoid(gi[:, :hid] + gh[:, :hid])
        z = jax.nn.sigmoid(gi[:, hid:2 * hid] + gh[:, hid:2 * hid])
        n = jnp.tanh(gi[:, 2 * hid:] + r * gh[:, 2 * hid:])
        h = (1.0 - z) * n + z * h                                     # GRU update (f32)
        hs.append(h)

    # Single dense (T, H) store -> one unmasked HBM writeback at kernel end.
    out_ref[...] = jnp.concatenate(hs, axis=0)


def pack_params(params):
    """One-time repack of PyTorch-style params: transpose, gate-pack r|z|n, cast bf16."""
    emb, w_ih, w_hh, b_ih, b_hh = params
    w_ih_t = w_ih.T.astype(jnp.bfloat16)                 # (H, 3H): x @ W_ih^T layout
    w_hh_t = w_hh.T.astype(jnp.bfloat16)                 # (H, 3H): h @ W_hh^T layout
    b_ih2 = b_ih.reshape(1, 3 * H).astype(jnp.float32)
    b_hh2 = b_hh.reshape(1, 3 * H).astype(jnp.float32)
    emb_bf = emb.astype(jnp.bfloat16)                    # (V, H)
    return emb_bf, w_ih_t, w_hh_t, b_ih2, b_hh2


def encoder_forward(tokens, hidden, packed):
    """tokens: int32 (T,); hidden: (1,1,H) f32; packed: output of pack_params.

    Runs T Encoder.forward steps (embedding lookup + GRU cell) in one pallas_call.
    Returns (outputs (T,1,H), final hidden (1,1,H)); with T=1 this is exactly the
    original module forward (single-layer GRU: last output row == final hidden).
    """
    emb_bf, w_ih_t, w_hh_t, b_ih2, b_hh2 = packed
    seq_len = int(tokens.shape[0])
    tok2d = tokens.reshape(seq_len, 1).astype(jnp.int32)
    h0 = hidden.reshape(1, H).astype(jnp.float32)

    out = pl.pallas_call(
        encoder_gru_kernel,
        out_shape=jax.ShapeDtypeStruct((seq_len, H), jnp.float32),
        grid=(1,),
        in_specs=[
            pl.BlockSpec((seq_len, 1), lambda i: (0, 0)),    # token ids (VMEM column)
            pl.BlockSpec((V, H), lambda i: (0, 0)),          # embedding table, resident
            pl.BlockSpec((H, 3 * H), lambda i: (0, 0)),      # W_ih^T packed r|z|n (bf16)
            pl.BlockSpec((H, 3 * H), lambda i: (0, 0)),      # W_hh^T packed r|z|n (bf16)
            pl.BlockSpec((1, 3 * H), lambda i: (0, 0)),      # b_ih (f32)
            pl.BlockSpec((1, 3 * H), lambda i: (0, 0)),      # b_hh (f32)
            pl.BlockSpec((1, H), lambda i: (0, 0)),          # initial hidden (f32)
        ],
        out_specs=pl.BlockSpec((seq_len, H), lambda i: (0, 0)),
        compiler_params=pltpu.CompilerParams(
            dimension_semantics=("arbitrary",),              # single sequential step
        ),
    )(tok2d, emb_bf, w_ih_t, w_hh_t, b_ih2, b_hh2, h0)

    output = out.reshape(seq_len, 1, H)                      # per-step GRU outputs
    hidden_out = out[seq_len - 1].reshape(1, 1, H)           # final hidden == last row
    return output, hidden_out


def encoder_forward_ref(tokens, hidden, params):
    """Pure-JAX reference mirroring PyTorch Embedding + GRU over the sequence,
    with the same bf16 weight/hidden quantization the kernel uses."""
    emb, w_ih, w_hh, b_ih, b_hh = params
    hp = jax.lax.Precision.HIGHEST
    embq = emb.astype(jnp.bfloat16).astype(jnp.float32)
    wihq = w_ih.T.astype(jnp.bfloat16).astype(jnp.float32)   # (H, 3H)
    whhq = w_hh.T.astype(jnp.bfloat16).astype(jnp.float32)   # (H, 3H)
    bih = b_ih.reshape(1, 3 * H).astype(jnp.float32)
    bhh = b_hh.reshape(1, 3 * H).astype(jnp.float32)
    h = hidden.reshape(1, H).astype(jnp.float32)
    outs = []
    for t in range(tokens.shape[0]):
        x = embq[tokens[t]].reshape(1, H)
        gi = jnp.dot(x, wihq, precision=hp) + bih
        hq = h.astype(jnp.bfloat16).astype(jnp.float32)
        gh = jnp.dot(hq, whhq, precision=hp) + bhh
        r = jax.nn.sigmoid(gi[:, :H] + gh[:, :H])
        z = jax.nn.sigmoid(gi[:, H:2 * H] + gh[:, H:2 * H])
        n = jnp.tanh(gi[:, 2 * H:] + r * gh[:, 2 * H:])
        h = (1.0 - z) * n + z * h
        outs.append(h)
    out = jnp.stack(outs, axis=0).reshape(-1, 1, H)
    return out, h.reshape(1, 1, H)


def init_params(key):
    """PyTorch-style parameter shapes: nn.Embedding(V,H), nn.GRU(H,H) layer 0."""
    k_emb, k_wih, k_whh, k_bih, k_bhh = jax.random.split(key, 5)
    bound = 1.0 / jnp.sqrt(H)
    emb = jax.random.normal(k_emb, (V, H), jnp.float32)                       # embedding.weight
    w_ih = jax.random.uniform(k_wih, (3 * H, H), jnp.float32, -bound, bound)  # weight_ih_l0
    w_hh = jax.random.uniform(k_whh, (3 * H, H), jnp.float32, -bound, bound)  # weight_hh_l0
    b_ih = jax.random.uniform(k_bih, (3 * H,), jnp.float32, -bound, bound)    # bias_ih_l0
    b_hh = jax.random.uniform(k_bhh, (3 * H,), jnp.float32, -bound, bound)    # bias_hh_l0
    return emb, w_ih, w_hh, b_ih, b_hh


if __name__ == "__main__":
    key = jax.random.PRNGKey(0)
    params = init_params(key)
    packed = pack_params(params)          # one-time transpose / gate-pack / bf16 cast

    tokens = jax.random.randint(jax.random.fold_in(key, 1), (T,), 0, V, dtype=jnp.int32)
    hidden0 = jnp.zeros((1, 1, H), dtype=jnp.float32)      # Encoder.initHidden()

    out, hid = encoder_forward(tokens, hidden0, packed)
    out = jax.block_until_ready(out)
    hid = jax.block_until_ready(hid)

    ref_out, ref_hid = encoder_forward_ref(tokens, hidden0, params)

    assert out.shape == (T, 1, H) and hid.shape == (1, 1, H)
    assert jnp.allclose(out, ref_out, atol=2e-3, rtol=2e-3), "output mismatch vs reference"
    assert jnp.allclose(hid, ref_hid, atol=2e-3, rtol=2e-3), "hidden mismatch vs reference"

    print("KERNEL_OK")
</pallas_src>

<mosaic_0001>
module attributes {stable_mosaic.version = 11 : i64} {
  func.func @encoder_gru_kernel(%arg0: i32, %arg1: memref<8x1xi32, #tpu.memory_space<vmem>>, %arg2: memref<16x128xbf16, #tpu.memory_space<vmem>>, %arg3: memref<128x384xbf16, #tpu.memory_space<vmem>>, %arg4: memref<128x384xbf16, #tpu.memory_space<vmem>>, %arg5: memref<1x384xf32, #tpu.memory_space<vmem>>, %arg6: memref<1x384xf32, #tpu.memory_space<vmem>>, %arg7: memref<1x128xf32, #tpu.memory_space<vmem>>, %arg8: memref<8x128xf32, #tpu.memory_space<vmem>>) attributes {dimension_semantics = [#tpu.dimension_semantics<arbitrary>], iteration_bounds = array<i64: 1>, scalar_prefetch = 0 : i64, scratch_operands = 0 : i64, tpu.core_type = #tpu.core_type<tc>, window_params = [{pipeline_mode = #tpu.pipeline_mode<synchronous>, transform_indices = @transform_0, window_bounds = array<i64: 8, 1>}, {pipeline_mode = #tpu.pipeline_mode<synchronous>, transform_indices = @transform_1, window_bounds = array<i64: 16, 128>}, {pipeline_mode = #tpu.pipeline_mode<synchronous>, transform_indices = @transform_2, window_bounds = array<i64: 128, 384>}, {pipeline_mode = #tpu.pipeline_mode<synchronous>, transform_indices = @transform_3, window_bounds = array<i64: 128, 384>}, {pipeline_mode = #tpu.pipeline_mode<synchronous>, transform_indices = @transform_4, window_bounds = array<i64: 1, 384>}, {pipeline_mode = #tpu.pipeline_mode<synchronous>, transform_indices = @transform_5, window_bounds = array<i64: 1, 384>}, {pipeline_mode = #tpu.pipeline_mode<synchronous>, transform_indices = @transform_6, window_bounds = array<i64: 1, 128>}, {pipeline_mode = #tpu.pipeline_mode<synchronous>, transform_indices = @transform_7, window_bounds = array<i64: 8, 128>}]} {
    %c0 = arith.constant 0 : index
    %c0_0 = arith.constant 0 : index
    %0 = vector.load %arg1[%c0, %c0_0] : memref<8x1xi32, #tpu.memory_space<vmem>>, vector<8x1xi32>
    %1 = tpu.iota {dimensions = array<i32: 1>} : vector<8x16xi32>
    %2 = vector.broadcast %0 : vector<8x1xi32> to vector<8x16xi32>
    %3 = arith.cmpi eq, %1, %2 : vector<8x16xi32>
    %4 = arith.extui %3 : vector<8x16xi1> to vector<8x16xi32>
    %5 = arith.sitofp %4 : vector<8x16xi32> to vector<8x16xf32>
    %6 = arith.truncf %5 : vector<8x16xf32> to vector<8x16xbf16>
    %c0_1 = arith.constant 0 : index
    %c0_2 = arith.constant 0 : index
    %7 = vector.load %arg2[%c0_1, %c0_2] : memref<16x128xbf16, #tpu.memory_space<vmem>>, vector<16x128xbf16>
    %cst = arith.constant dense<0.000000e+00> : vector<8x128xf32>
    %8 = tpu.matmul %6, %7, %cst {dimension_numbers = #tpu.dot_dimension_numbers<[1], [0], [0], [1], [0, 0, 1, 1], [], []>} : vector<8x16xbf16>, vector<16x128xbf16>, vector<8x128xf32> -> vector<8x128xf32>
    %9 = arith.truncf %8 : vector<8x128xf32> to vector<8x128xbf16>
    %c0_3 = arith.constant 0 : index
    %c0_4 = arith.constant 0 : index
    %10 = vector.load %arg3[%c0_3, %c0_4] : memref<128x384xbf16, #tpu.memory_space<vmem>>, vector<128x384xbf16>
    %cst_5 = arith.constant dense<0.000000e+00> : vector<8x384xf32>
    %11 = tpu.matmul %9, %10, %cst_5 {dimension_numbers = #tpu.dot_dimension_numbers<[1], [0], [0], [1], [0, 0, 1, 1], [], []>} : vector<8x128xbf16>, vector<128x384xbf16>, vector<8x384xf32> -> vector<8x384xf32>
    %c0_6 = arith.constant 0 : index
    %c0_7 = arith.constant 0 : index
    %12 = vector.load %arg5[%c0_6, %c0_7] : memref<1x384xf32, #tpu.memory_space<vmem>>, vector<1x384xf32>
    %13 = vector.broadcast %12 : vector<1x384xf32> to vector<8x384xf32>
    %14 = arith.addf %11, %13 : vector<8x384xf32>
    %c0_8 = arith.constant 0 : index
    %c0_9 = arith.constant 0 : index
    %15 = vector.load %arg4[%c0_8, %c0_9] : memref<128x384xbf16, #tpu.memory_space<vmem>>, vector<128x384xbf16>
    %c0_10 = arith.constant 0 : index
    %c0_11 = arith.constant 0 : index
    %16 = vector.load %arg6[%c0_10, %c0_11] : memref<1x384xf32, #tpu.memory_space<vmem>>, vector<1x384xf32>
    %c0_12 = arith.constant 0 : index
    %c0_13 = arith.constant 0 : index
    %17 = vector.load %arg7[%c0_12, %c0_13] : memref<1x128xf32, #tpu.memory_space<vmem>>, vector<1x128xf32>
    %18 = vector.extract_strided_slice %14 {offsets = [0, 0], sizes = [1, 384], strides = [1, 1]} : vector<8x384xf32> to vector<1x384xf32>
    %19 = arith.truncf %17 : vector<1x128xf32> to vector<1x128xbf16>
    %cst_14 = arith.constant dense<0.000000e+00> : vector<1x384xf32>
    %20 = tpu.matmul %19, %15, %cst_14 {dimension_numbers = #tpu.dot_dimension_numbers<[1], [0], [0], [1], [0, 0, 1, 1], [], []>} : vector<1x128xbf16>, vector<128x384xbf16>, vector<1x384xf32> -> vector<1x384xf32>
    %21 = arith.addf %20, %16 : vector<1x384xf32>
    %22 = vector.extract_strided_slice %18 {offsets = [0, 0], sizes = [1, 128], strides = [1, 1]} : vector<1x384xf32> to vector<1x128xf32>
    %23 = vector.extract_strided_slice %21 {offsets = [0, 0], sizes = [1, 128], strides = [1, 1]} : vector<1x384xf32> to vector<1x128xf32>
    %24 = arith.addf %22, %23 : vector<1x128xf32>
    %25 = arith.negf %24 : vector<1x128xf32>
    %26 = math.exp %25 : vector<1x128xf32>
    %cst_15 = arith.constant 1.000000e+00 : f32
    %27 = vector.broadcast %cst_15 : f32 to vector<1x128xf32>
    %28 = arith.addf %27, %26 : vector<1x128xf32>
    %29 = arith.divf %27, %28 : vector<1x128xf32>
    %30 = vector.extract_strided_slice %18 {offsets = [0, 128], sizes = [1, 128], strides = [1, 1]} : vector<1x384xf32> to vector<1x128xf32>
    %31 = vector.extract_strided_slice %21 {offsets = [0, 128], sizes = [1, 128], strides = [1, 1]} : vector<1x384xf32> to vector<1x128xf32>
    %32 = arith.addf %30, %31 : vector<1x128xf32>
    %33 = arith.negf %32 : vector<1x128xf32>
    %34 = math.exp %33 : vector<1x128xf32>
    %cst_16 = arith.constant 1.000000e+00 : f32
    %35 = vector.broadcast %cst_16 : f32 to vector<1x128xf32>
    %36 = arith.addf %35, %34 : vector<1x128xf32>
    %37 = arith.divf %35, %36 : vector<1x128xf32>
    %38 = vector.extract_strided_slice %18 {offsets = [0, 256], sizes = [1, 128], strides = [1, 1]} : vector<1x384xf32> to vector<1x128xf32>
    %39 = vector.extract_strided_slice %21 {offsets = [0, 256], sizes = [1, 128], strides = [1, 1]} : vector<1x384xf32> to vector<1x128xf32>
    %40 = arith.mulf %29, %39 : vector<1x128xf32>
    %41 = arith.addf %38, %40 : vector<1x128xf32>
    %42 = math.tanh %41 : vector<1x128xf32>
    %cst_17 = arith.constant 1.000000e+00 : f32
    %43 = vector.broadcast %cst_17 : f32 to vector<1x128xf32>
    %44 = arith.subf %43, %37 : vector<1x128xf32>
    %45 = arith.mulf %44, %42 : vector<1x128xf32>
    %46 = arith.mulf %37, %17 : vector<1x128xf32>
    %47 = arith.addf %45, %46 : vector<1x128xf32>
    %48 = vector.extract_strided_slice %14 {offsets = [1, 0], sizes = [1, 384], strides = [1, 1]} : vector<8x384xf32> to vector<1x384xf32>
    %49 = arith.truncf %47 : vector<1x128xf32> to vector<1x128xbf16>
    %cst_18 = arith.constant dense<0.000000e+00> : vector<1x384xf32>
    %50 = tpu.matmul %49, %15, %cst_18 {dimension_numbers = #tpu.dot_dimension_numbers<[1], [0], [0], [1], [0, 0, 1, 1], [], []>} : vector<1x128xbf16>, vector<128x384xbf16>, vector<1x384xf32> -> vector<1x384xf32>
    %51 = arith.addf %50, %16 : vector<1x384xf32>
    %52 = vector.extract_strided_slice %48 {offsets = [0, 0], sizes = [1, 128], strides = [1, 1]} : vector<1x384xf32> to vector<1x128xf32>
    %53 = vector.extract_strided_slice %51 {offsets = [0, 0], sizes = [1, 128], strides = [1, 1]} : vector<1x384xf32> to vector<1x128xf32>
    %54 = arith.addf %52, %53 : vector<1x128xf32>
    %55 = arith.negf %54 : vector<1x128xf32>
    %56 = math.exp %55 : vector<1x128xf32>
    %cst_19 = arith.constant 1.000000e+00 : f32
    %57 = vector.broadcast %cst_19 : f32 to vector<1x128xf32>
    %58 = arith.addf %57, %56 : vector<1x128xf32>
    %59 = arith.divf %57, %58 : vector<1x128xf32>
    %60 = vector.extract_strided_slice %48 {offsets = [0, 128], sizes = [1, 128], strides = [1, 1]} : vector<1x384xf32> to vector<1x128xf32>
    %61 = vector.extract_strided_slice %51 {offsets = [0, 128], sizes = [1, 128], strides = [1, 1]} : vector<1x384xf32> to vector<1x128xf32>
    %62 = arith.addf %60, %61 : vector<1x128xf32>
    %63 = arith.negf %62 : vector<1x128xf32>
    %64 = math.exp %63 : vector<1x128xf32>
    %cst_20 = arith.constant 1.000000e+00 : f32
    %65 = vector.broadcast %cst_20 : f32 to vector<1x128xf32>
    %66 = arith.addf %65, %64 : vector<1x128xf32>
    %67 = arith.divf %65, %66 : vector<1x128xf32>
    %68 = vector.extract_strided_slice %48 {offsets = [0, 256], sizes = [1, 128], strides = [1, 1]} : vector<1x384xf32> to vector<1x128xf32>
    %69 = vector.extract_strided_slice %51 {offsets = [0, 256], sizes = [1, 128], strides = [1, 1]} : vector<1x384xf32> to vector<1x128xf32>
    %70 = arith.mulf %59, %69 : vector<1x128xf32>
    %71 = arith.addf %68, %70 : vector<1x128xf32>
    %72 = math.tanh %71 : vector<1x128xf32>
    %cst_21 = arith.constant 1.000000e+00 : f32
    %73 = vector.broadcast %cst_21 : f32 to vector<1x128xf32>
    %74 = arith.subf %73, %67 : vector<1x128xf32>
    %75 = arith.mulf %74, %72 : vector<1x128xf32>
    %76 = arith.mulf %67, %47 : vector<1x128xf32>
    %77 = arith.addf %75, %76 : vector<1x128xf32>
    %78 = vector.extract_strided_slice %14 {offsets = [2, 0], sizes = [1, 384], strides = [1, 1]} : vector<8x384xf32> to vector<1x384xf32>
    %79 = arith.truncf %77 : vector<1x128xf32> to vector<1x128xbf16>
    %cst_22 = arith.constant dense<0.000000e+00> : vector<1x384xf32>
    %80 = tpu.matmul %79, %15, %cst_22 {dimension_numbers = #tpu.dot_dimension_numbers<[1], [0], [0], [1], [0, 0, 1, 1], [], []>} : vector<1x128xbf16>, vector<128x384xbf16>, vector<1x384xf32> -> vector<1x384xf32>
    %81 = arith.addf %80, %16 : vector<1x384xf32>
    %82 = vector.extract_strided_slice %78 {offsets = [0, 0], sizes = [1, 128], strides = [1, 1]} : vector<1x384xf32> to vector<1x128xf32>
    %83 = vector.extract_strided_slice %81 {offsets = [0, 0], sizes = [1, 128], strides = [1, 1]} : vector<1x384xf32> to vector<1x128xf32>
    %84 = arith.addf %82, %83 : vector<1x128xf32>
    %85 = arith.negf %84 : vector<1x128xf32>
    %86 = math.exp %85 : vector<1x128xf32>
    %cst_23 = arith.constant 1.000000e+00 : f32
    %87 = vector.broadcast %cst_23 : f32 to vector<1x128xf32>
    %88 = arith.addf %87, %86 : vector<1x128xf32>
    %89 = arith.divf %87, %88 : vector<1x128xf32>
    %90 = vector.extract_strided_slice %78 {offsets = [0, 128], sizes = [1, 128], strides = [1, 1]} : vector<1x384xf32> to vector<1x128xf32>
    %91 = vector.extract_strided_slice %81 {offsets = [0, 128], sizes = [1, 128], strides = [1, 1]} : vector<1x384xf32> to vector<1x128xf32>
    %92 = arith.addf %90, %91 : vector<1x128xf32>
    %93 = arith.negf %92 : vector<1x128xf32>
    %94 = math.exp %93 : vector<1x128xf32>
    %cst_24 = arith.constant 1.000000e+00 : f32
    %95 = vector.broadcast %cst_24 : f32 to vector<1x128xf32>
    %96 = arith.addf %95, %94 : vector<1x128xf32>
    %97 = arith.divf %95, %96 : vector<1x128xf32>
    %98 = vector.extract_strided_slice %78 {offsets = [0, 256], sizes = [1, 128], strides = [1, 1]} : vector<1x384xf32> to vector<1x128xf32>
    %99 = vector.extract_strided_slice %81 {offsets = [0, 256], sizes = [1, 128], strides = [1, 1]} : vector<1x384xf32> to vector<1x128xf32>
    %100 = arith.mulf %89, %99 : vector<1x128xf32>
    %101 = arith.addf %98, %100 : vector<1x128xf32>
    %102 = math.tanh %101 : vector<1x128xf32>
    %cst_25 = arith.constant 1.000000e+00 : f32
    %103 = vector.broadcast %cst_25 : f32 to vector<1x128xf32>
    %104 = arith.subf %103, %97 : vector<1x128xf32>
    %105 = arith.mulf %104, %102 : vector<1x128xf32>
    %106 = arith.mulf %97, %77 : vector<1x128xf32>
    %107 = arith.addf %105, %106 : vector<1x128xf32>
    %108 = vector.extract_strided_slice %14 {offsets = [3, 0], sizes = [1, 384], strides = [1, 1]} : vector<8x384xf32> to vector<1x384xf32>
    %109 = arith.truncf %107 : vector<1x128xf32> to vector<1x128xbf16>
    %cst_26 = arith.constant dense<0.000000e+00> : vector<1x384xf32>
    %110 = tpu.matmul %109, %15, %cst_26 {dimension_numbers = #tpu.dot_dimension_numbers<[1], [0], [0], [1], [0, 0, 1, 1], [], []>} : vector<1x128xbf16>, vector<128x384xbf16>, vector<1x384xf32> -> vector<1x384xf32>
    %111 = arith.addf %110, %16 : vector<1x384xf32>
    %112 = vector.extract_strided_slice %108 {offsets = [0, 0], sizes = [1, 128], strides = [1, 1]} : vector<1x384xf32> to vector<1x128xf32>
    %113 = vector.extract_strided_slice %111 {offsets = [0, 0], sizes = [1, 128], strides = [1, 1]} : vector<1x384xf32> to vector<1x128xf32>
    %114 = arith.addf %112, %113 : vector<1x128xf32>
    %115 = arith.negf %114 : vector<1x128xf32>
    %116 = math.exp %115 : vector<1x128xf32>
    %cst_27 = arith.constant 1.000000e+00 : f32
    %117 = vector.broadcast %cst_27 : f32 to vector<1x128xf32>
    %118 = arith.addf %117, %116 : vector<1x128xf32>
    %119 = arith.divf %117, %118 : vector<1x128xf32>
    %120 = vector.extract_strided_slice %108 {offsets = [0, 128], sizes = [1, 128], strides = [1, 1]} : vector<1x384xf32> to vector<1x128xf32>
    %121 = vector.extract_strided_slice %111 {offsets = [0, 128], sizes = [1, 128], strides = [1, 1]} : vector<1x384xf32> to vector<1x128xf32>
    %122 = arith.addf %120, %121 : vector<1x128xf32>
    %123 = arith.negf %122 : vector<1x128xf32>
    %124 = math.exp %123 : vector<1x128xf32>
    %cst_28 = arith.constant 1.000000e+00 : f32
    %125 = vector.broadcast %cst_28 : f32 to vector<1x128xf32>
    %126 = arith.addf %125, %124 : vector<1x128xf32>
    %127 = arith.divf %125, %126 : vector<1x128xf32>
    %128 = vector.extract_strided_slice %108 {offsets = [0, 256], sizes = [1, 128], strides = [1, 1]} : vector<1x384xf32> to vector<1x128xf32>
    %129 = vector.extract_strided_slice %111 {offsets = [0, 256], sizes = [1, 128], strides = [1, 1]} : vector<1x384xf32> to vector<1x128xf32>
    %130 = arith.mulf %119, %129 : vector<1x128xf32>
    %131 = arith.addf %128, %130 : vector<1x128xf32>
    %132 = math.tanh %131 : vector<1x128xf32>
    %cst_29 = arith.constant 1.000000e+00 : f32
    %133 = vector.broadcast %cst_29 : f32 to vector<1x128xf32>
    %134 = arith.subf %133, %127 : vector<1x128xf32>
    %135 = arith.mulf %134, %132 : vector<1x128xf32>
    %136 = arith.mulf %127, %107 : vector<1x128xf32>
    %137 = arith.addf %135, %136 : vector<1x128xf32>
    %138 = vector.extract_strided_slice %14 {offsets = [4, 0], sizes = [1, 384], strides = [1, 1]} : vector<8x384xf32> to vector<1x384xf32>
    %139 = arith.truncf %137 : vector<1x128xf32> to vector<1x128xbf16>
    %cst_30 = arith.constant dense<0.000000e+00> : vector<1x384xf32>
    %140 = tpu.matmul %139, %15, %cst_30 {dimension_numbers = #tpu.dot_dimension_numbers<[1], [0], [0], [1], [0, 0, 1, 1], [], []>} : vector<1x128xbf16>, vector<128x384xbf16>, vector<1x384xf32> -> vector<1x384xf32>
    %141 = arith.addf %140, %16 : vector<1x384xf32>
    %142 = vector.extract_strided_slice %138 {offsets = [0, 0], sizes = [1, 128], strides = [1, 1]} : vector<1x384xf32> to vector<1x128xf32>
    %143 = vector.extract_strided_slice %141 {offsets = [0, 0], sizes = [1, 128], strides = [1, 1]} : vector<1x384xf32> to vector<1x128xf32>
    %144 = arith.addf %142, %143 : vector<1x128xf32>
    %145 = arith.negf %144 : vector<1x128xf32>
    %146 = math.exp %145 : vector<1x128xf32>
    %cst_31 = arith.constant 1.000000e+00 : f32
    %147 = vector.broadcast %cst_31 : f32 to vector<1x128xf32>
    %148 = arith.addf %147, %146 : vector<1x128xf32>
    %149 = arith.divf %147, %148 : vector<1x128xf32>
    %150 = vector.extract_strided_slice %138 {offsets = [0, 128], sizes = [1, 128], strides = [1, 1]} : vector<1x384xf32> to vector<1x128xf32>
    %151 = vector.extract_strided_slice %141 {offsets = [0, 128], sizes = [1, 128], strides = [1, 1]} : vector<1x384xf32> to vector<1x128xf32>
    %152 = arith.addf %150, %151 : vector<1x128xf32>
    %153 = arith.negf %152 : vector<1x128xf32>
    %154 = math.exp %153 : vector<1x128xf32>
    %cst_32 = arith.constant 1.000000e+00 : f32
    %155 = vector.broadcast %cst_32 : f32 to vector<1x128xf32>
    %156 = arith.addf %155, %154 : vector<1x128xf32>
    %157 = arith.divf %155, %156 : vector<1x128xf32>
    %158 = vector.extract_strided_slice %138 {offsets = [0, 256], sizes = [1, 128], strides = [1, 1]} : vector<1x384xf32> to vector<1x128xf32>
    %159 = vector.extract_strided_slice %141 {offsets = [0, 256], sizes = [1, 128], strides = [1, 1]} : vector<1x384xf32> to vector<1x128xf32>
    %160 = arith.mulf %149, %159 : vector<1x128xf32>
    %161 = arith.addf %158, %160 : vector<1x128xf32>
    %162 = math.tanh %161 : vector<1x128xf32>
    %cst_33 = arith.constant 1.000000e+00 : f32
    %163 = vector.broadcast %cst_33 : f32 to vector<1x128xf32>
    %164 = arith.subf %163, %157 : vector<1x128xf32>
    %165 = arith.mulf %164, %162 : vector<1x128xf32>
    %166 = arith.mulf %157, %137 : vector<1x128xf32>
    %167 = arith.addf %165, %166 : vector<1x128xf32>
    %168 = vector.extract_strided_slice %14 {offsets = [5, 0], sizes = [1, 384], strides = [1, 1]} : vector<8x384xf32> to vector<1x384xf32>
    %169 = arith.truncf %167 : vector<1x128xf32> to vector<1x128xbf16>
    %cst_34 = arith.constant dense<0.000000e+00> : vector<1x384xf32>
    %170 = tpu.matmul %169, %15, %cst_34 {dimension_numbers = #tpu.dot_dimension_numbers<[1], [0], [0], [1], [0, 0, 1, 1], [], []>} : vector<1x128xbf16>, vector<128x384xbf16>, vector<1x384xf32> -> vector<1x384xf32>
    %171 = arith.addf %170, %16 : vector<1x384xf32>
    %172 = vector.extract_strided_slice %168 {offsets = [0, 0], sizes = [1, 128], strides = [1, 1]} : vector<1x384xf32> to vector<1x128xf32>
    %173 = vector.extract_strided_slice %171 {offsets = [0, 0], sizes = [1, 128], strides = [1, 1]} : vector<1x384xf32> to vector<1x128xf32>
    %174 = arith.addf %172, %173 : vector<1x128xf32>
    %175 = arith.negf %174 : vector<1x128xf32>
    %176 = math.exp %175 : vector<1x128xf32>
    %cst_35 = arith.constant 1.000000e+00 : f32
    %177 = vector.broadcast %cst_35 : f32 to vector<1x128xf32>
    %178 = arith.addf %177, %176 : vector<1x128xf32>
    %179 = arith.divf %177, %178 : vector<1x128xf32>
    %180 = vector.extract_strided_slice %168 {offsets = [0, 128], sizes = [1, 128], strides = [1, 1]} : vector<1x384xf32> to vector<1x128xf32>
    %181 = vector.extract_strided_slice %171 {offsets = [0, 128], sizes = [1, 128], strides = [1, 1]} : vector<1x384xf32> to vector<1x128xf32>
    %182 = arith.addf %180, %181 : vector<1x128xf32>
    %183 = arith.negf %182 : vector<1x128xf32>
    %184 = math.exp %183 : vector<1x128xf32>
    %cst_36 = arith.constant 1.000000e+00 : f32
    %185 = vector.broadcast %cst_36 : f32 to vector<1x128xf32>
    %186 = arith.addf %185, %184 : vector<1x128xf32>
    %187 = arith.divf %185, %186 : vector<1x128xf32>
    %188 = vector.extract_strided_slice %168 {offsets = [0, 256], sizes = [1, 128], strides = [1, 1]} : vector<1x384xf32> to vector<1x128xf32>
    %189 = vector.extract_strided_slice %171 {offsets = [0, 256], sizes = [1, 128], strides = [1, 1]} : vector<1x384xf32> to vector<1x128xf32>
    %190 = arith.mulf %179, %189 : vector<1x128xf32>
    %191 = arith.addf %188, %190 : vector<1x128xf32>
    %192 = math.tanh %191 : vector<1x128xf32>
    %cst_37 = arith.constant 1.000000e+00 : f32
    %193 = vector.broadcast %cst_37 : f32 to vector<1x128xf32>
    %194 = arith.subf %193, %187 : vector<1x128xf32>
    %195 = arith.mulf %194, %192 : vector<1x128xf32>
    %196 = arith.mulf %187, %167 : vector<1x128xf32>
    %197 = arith.addf %195, %196 : vector<1x128xf32>
    %198 = vector.extract_strided_slice %14 {offsets = [6, 0], sizes = [1, 384], strides = [1, 1]} : vector<8x384xf32> to vector<1x384xf32>
    %199 = arith.truncf %197 : vector<1x128xf32> to vector<1x128xbf16>
    %cst_38 = arith.constant dense<0.000000e+00> : vector<1x384xf32>
    %200 = tpu.matmul %199, %15, %cst_38 {dimension_numbers = #tpu.dot_dimension_numbers<[1], [0], [0], [1], [0, 0, 1, 1], [], []>} : vector<1x128xbf16>, vector<128x384xbf16>, vector<1x384xf32> -> vector<1x384xf32>
    %201 = arith.addf %200, %16 : vector<1x384xf32>
    %202 = vector.extract_strided_slice %198 {offsets = [0, 0], sizes = [1, 128], strides = [1, 1]} : vector<1x384xf32> to vector<1x128xf32>
    %203 = vector.extract_strided_slice %201 {offsets = [0, 0], sizes = [1, 128], strides = [1, 1]} : vector<1x384xf32> to vector<1x128xf32>
    %204 = arith.addf %202, %203 : vector<1x128xf32>
    %205 = arith.negf %204 : vector<1x128xf32>
    %206 = math.exp %205 : vector<1x128xf32>
    %cst_39 = arith.constant 1.000000e+00 : f32
    %207 = vector.broadcast %cst_39 : f32 to vector<1x128xf32>
    %208 = arith.addf %207, %206 : vector<1x128xf32>
    %209 = arith.divf %207, %208 : vector<1x128xf32>
    %210 = vector.extract_strided_slice %198 {offsets = [0, 128], sizes = [1, 128], strides = [1, 1]} : vector<1x384xf32> to vector<1x128xf32>
    %211 = vector.extract_strided_slice %201 {offsets = [0, 128], sizes = [1, 128], strides = [1, 1]} : vector<1x384xf32> to vector<1x128xf32>
    %212 = arith.addf %210, %211 : vector<1x128xf32>
    %213 = arith.negf %212 : vector<1x128xf32>
    %214 = math.exp %213 : vector<1x128xf32>
    %cst_40 = arith.constant 1.000000e+00 : f32
    %215 = vector.broadcast %cst_40 : f32 to vector<1x128xf32>
    %216 = arith.addf %215, %214 : vector<1x128xf32>
    %217 = arith.divf %215, %216 : vector<1x128xf32>
    %218 = vector.extract_strided_slice %198 {offsets = [0, 256], sizes = [1, 128], strides = [1, 1]} : vector<1x384xf32> to vector<1x128xf32>
    %219 = vector.extract_strided_slice %201 {offsets = [0, 256], sizes = [1, 128], strides = [1, 1]} : vector<1x384xf32> to vector<1x128xf32>
    %220 = arith.mulf %209, %219 : vector<1x128xf32>
    %221 = arith.addf %218, %220 : vector<1x128xf32>
    %222 = math.tanh %221 : vector<1x128xf32>
    %cst_41 = arith.constant 1.000000e+00 : f32
    %223 = vector.broadcast %cst_41 : f32 to vector<1x128xf32>
    %224 = arith.subf %223, %217 : vector<1x128xf32>
    %225 = arith.mulf %224, %222 : vector<1x128xf32>
    %226 = arith.mulf %217, %197 : vector<1x128xf32>
    %227 = arith.addf %225, %226 : vector<1x128xf32>
    %228 = vector.extract_strided_slice %14 {offsets = [7, 0], sizes = [1, 384], strides = [1, 1]} : vector<8x384xf32> to vector<1x384xf32>
    %229 = arith.truncf %227 : vector<1x128xf32> to vector<1x128xbf16>
    %cst_42 = arith.constant dense<0.000000e+00> : vector<1x384xf32>
    %230 = tpu.matmul %229, %15, %cst_42 {dimension_numbers = #tpu.dot_dimension_numbers<[1], [0], [0], [1], [0, 0, 1, 1], [], []>} : vector<1x128xbf16>, vector<128x384xbf16>, vector<1x384xf32> -> vector<1x384xf32>
    %231 = arith.addf %230, %16 : vector<1x384xf32>
    %232 = vector.extract_strided_slice %228 {offsets = [0, 0], sizes = [1, 128], strides = [1, 1]} : vector<1x384xf32> to vector<1x128xf32>
    %233 = vector.extract_strided_slice %231 {offsets = [0, 0], sizes = [1, 128], strides = [1, 1]} : vector<1x384xf32> to vector<1x128xf32>
    %234 = arith.addf %232, %233 : vector<1x128xf32>
    %235 = arith.negf %234 : vector<1x128xf32>
    %236 = math.exp %235 : vector<1x128xf32>
    %cst_43 = arith.constant 1.000000e+00 : f32
    %237 = vector.broadcast %cst_43 : f32 to vector<1x128xf32>
    %238 = arith.addf %237, %236 : vector<1x128xf32>
    %239 = arith.divf %237, %238 : vector<1x128xf32>
    %240 = vector.extract_strided_slice %228 {offsets = [0, 128], sizes = [1, 128], strides = [1, 1]} : vector<1x384xf32> to vector<1x128xf32>
    %241 = vector.extract_strided_slice %231 {offsets = [0, 128], sizes = [1, 128], strides = [1, 1]} : vector<1x384xf32> to vector<1x128xf32>
    %242 = arith.addf %240, %241 : vector<1x128xf32>
    %243 = arith.negf %242 : vector<1x128xf32>
    %244 = math.exp %243 : vector<1x128xf32>
    %cst_44 = arith.constant 1.000000e+00 : f32
    %245 = vector.broadcast %cst_44 : f32 to vector<1x128xf32>
    %246 = arith.addf %245, %244 : vector<1x128xf32>
    %247 = arith.divf %245, %246 : vector<1x128xf32>
    %248 = vector.extract_strided_slice %228 {offsets = [0, 256], sizes = [1, 128], strides = [1, 1]} : vector<1x384xf32> to vector<1x128xf32>
    %249 = vector.extract_strided_slice %231 {offsets = [0, 256], sizes = [1, 128], strides = [1, 1]} : vector<1x384xf32> to vector<1x128xf32>
    %250 = arith.mulf %239, %249 : vector<1x128xf32>
    %251 = arith.addf %248, %250 : vector<1x128xf32>
    %252 = math.tanh %251 : vector<1x128xf32>
    %cst_45 = arith.constant 1.000000e+00 : f32
    %253 = vector.broadcast %cst_45 : f32 to vector<1x128xf32>
    %254 = arith.subf %253, %247 : vector<1x128xf32>
    %255 = arith.mulf %254, %252 : vector<1x128xf32>
    %256 = arith.mulf %247, %227 : vector<1x128xf32>
    %257 = arith.addf %255, %256 : vector<1x128xf32>
    %258 = tpu.concatenate %47, %77, %107, %137, %167, %197, %227, %257 in 0 : vector<1x128xf32>, vector<1x128xf32>, vector<1x128xf32>, vector<1x128xf32>, vector<1x128xf32>, vector<1x128xf32>, vector<1x128xf32>, vector<1x128xf32> -> vector<8x128xf32>
    %c0_46 = arith.constant 0 : index
    %c0_47 = arith.constant 0 : index
    %259 = vector.load %arg8[%c0_46, %c0_47] : memref<8x128xf32, #tpu.memory_space<vmem>>, vector<8x128xf32>
    tpu.vector_store %arg8[%c0_46, %c0_47], %258 {strides = array<i32>} : memref<8x128xf32, #tpu.memory_space<vmem>>, vector<8x128xf32>,
    return
  }
  func.func @transform_0(%arg0: i32) -> (i32, i32) {
    %c0_i32 = arith.constant 0 : i32
    %c0_i32_0 = arith.constant 0 : i32
    %c0_i32_1 = arith.constant 0 : i32
    return %c0_i32, %c0_i32_0 : i32, i32
  }
  func.func @transform_1(%arg0: i32) -> (i32, i32) {
    %c0_i32 = arith.constant 0 : i32
    %c0_i32_0 = arith.constant 0 : i32
    %c0_i32_1 = arith.constant 0 : i32
    return %c0_i32, %c0_i32_0 : i32, i32
  }
  func.func @transform_2(%arg0: i32) -> (i32, i32) {
    %c0_i32 = arith.constant 0 : i32
    %c0_i32_0 = arith.constant 0 : i32
    %c0_i32_1 = arith.constant 0 : i32
    return %c0_i32, %c0_i32_0 : i32, i32
  }
  func.func @transform_3(%arg0: i32) -> (i32, i32) {
    %c0_i32 = arith.constant 0 : i32
    %c0_i32_0 = arith.constant 0 : i32
    %c0_i32_1 = arith.constant 0 : i32
    return %c0_i32, %c0_i32_0 : i32, i32
  }
  func.func @transform_4(%arg0: i32) -> (i32, i32) {
    %c0_i32 = arith.constant 0 : i32
    %c0_i32_0 = arith.constant 0 : i32
    %c0_i32_1 = arith.constant 0 : i32
    return %c0_i32, %c0_i32_0 : i32, i32
  }
  func.func @transform_5(%arg0: i32) -> (i32, i32) {
    %c0_i32 = arith.constant 0 : i32
    %c0_i32_0 = arith.constant 0 : i32
    %c0_i32_1 = arith.constant 0 : i32
    return %c0_i32, %c0_i32_0 : i32, i32
  }
  func.func @transform_6(%arg0: i32) -> (i32, i32) {
    %c0_i32 = arith.constant 0 : i32
    %c0_i32_0 = arith.constant 0 : i32
    %c0_i32_1 = arith.constant 0 : i32
    return %c0_i32, %c0_i32_0 : i32, i32
  }
  func.func @transform_7(%arg0: i32) -> (i32, i32) {
    %c0_i32 = arith.constant 0 : i32
    %c0_i32_0 = arith.constant 0 : i32
    %c0_i32_1 = arith.constant 0 : i32
    return %c0_i32, %c0_i32_0 : i32, i32
  }
}

</mosaic_0001>

<bundles_post_ra>
// kernel: tpu_custom_call.1
= control target key start
LH: loop header
LB: loop body
LE: loop exit
PB: predicated region body
PF: predicated region fallthrough
CT: control target
= control target key end

     0   :  { %12 = vsyncpa [#allocation3], 0  ;;  %s2604_s0 = inlined_call_operand.vmem [shape: s32[8,1], index: 0, kind: input, shape index: {}]   ;;  %s2605_s1 = inlined_call_operand.vmem [shape: bf16[16,128], index: 1, kind: input, shape index: {}]   ;;  %s2606_s2 = inlined_call_operand.hbm [shape: bf16[128,384], index: 2, kind: input, shape index: {}]   ;;  %s2607_s3 = inlined_call_operand.hbm [shape: bf16[128,384], index: 3, kind: input, shape index: {}]   ;;  %s2608_s4 = inlined_call_operand.vmem [shape: f32[1,384], index: 4, kind: input, shape index: {}]   ;;  %s2609_s5 = inlined_call_operand.vmem [shape: f32[1,384], index: 5, kind: input, shape index: {}]   ;;  %s2610_s6 = inlined_call_operand.vmem [shape: f32[1,128], index: 6, kind: input, shape index: {}]   ;;  %s2611_s7 = inlined_call_operand.hbm [shape: f32[8,128], index: 7, kind: output, shape index: {}]  }
   0x1   :  { %13 = vsyncpa [#allocation6], 0 }
   0x2   :  { %14 = vsyncpa [#allocation4], 0  ;;  %s2096_s24 = smov [#allocation2]  }
   0x3   :  { %s24_s25 = sshll.u32 %s2096_s24, 4  ;;  %s25_s25 = int_to_ptr.vmem [resolvable:$true] %s24_s25 }
   0x4   :  { %s2038_s26 = scalar_lea.vmem %s25_s25, 3072  ;;  %p2043_p1 = scmp.lt.s32.totalorder %s25_s25, %s25_s25 }
   0x5   :  { %p2039_p0 = scmp.ne.s32.totalorder %s25_s25, %s2038_s26  ;;  %p2044_p2 = scmp.lt.s32.totalorder %s2038_s26, %s2038_s26 }
   0x7   :  { %p2045_p3 = por %p2044_p2, %p2043_p1 }
   0x9   :  { %p2046_p4 = pnand %p2045_p3, %p2039_p0 }
   0xb   :  { %2049 = shalt.err (!%p2046_p4)
}
   0xc   :  { %s2097_s27 = smov 192   ;;  %s2098_s28 = smov 12  }
   0xd   :  { %30 = dma.hbm_to_vmem [thread:$0]  %s2606_s2, 3072, %s25_s25, [#allocation3], %s2097_s27, %s2097_s27, %s2098_s28  }
   0xe   :  { %s2099_s8 = smov [#allocation5]  }
   0xf   :  { %s36_s9 = sshll.u32 %s2099_s8, 4  ;;  %s37_s9 = int_to_ptr.vmem [resolvable:$true] %s36_s9 }
  0x10   :  { %s2058_s10 = scalar_lea.vmem %s37_s9, 3072  ;;  %p2063_p6 = scmp.lt.s32.totalorder %s37_s9, %s37_s9 }
  0x11   :  { %p2059_p5 = scmp.ne.s32.totalorder %s37_s9, %s2058_s10  ;;  %p2064_p7 = scmp.lt.s32.totalorder %s2058_s10, %s2058_s10 }
  0x13   :  { %p2065_p8 = por %p2064_p7, %p2063_p6 }
  0x15   :  { %p2066_p9 = pnand %p2065_p8, %p2059_p5 }
  0x17   :  { %2069 = shalt.err (!%p2066_p9)
}
  0x18   :  { %42 = dma.hbm_to_vmem [thread:$0]  %s2607_s3, 3072, %s37_s9, [#allocation6], %s2097_s27, %s2097_s27, %s2098_s28  }
  0x19   :  { %2090 = dma.done.wait [#allocation3], 3072  }
  0x1a   :  { %2091 = vsyncadd [#allocation3], 4294964224 }
  0x1b   :  { %2092 = dma.done.wait [#allocation6], 3072  }
  0x1c   :  { %2093 = vsyncadd [#allocation6], 4294964224  ;;  %v2100_v0 = vmov 0   ;;  %v2101_v1 = vmov 0.0   ;;  %v56_v2 = vld [vmem:[%s2604_s0] sm:$0xff]  ;;  %vm2102_vm0 = vmmov 0   ;;  %v57_v20 = vlaneseq }
  0x1d   :  { %1861 = vset.pattern.permute.xlu0 %v2100_v0  ;;  %1667 = vmatprep.subr.bf16.mxu0 %v2101_v1  ;;  %v1862_v3 = vld [vmem:[%s2605_s1] sm:$0xff]   ;;  %v1863_v4 = vld [vmem:[#allocation2 + $0xac] ss:$12 sps:$4 sm:$0xff]   ;;  %v1865_v5 = vld [vmem:[#allocation2 + $0xa8] ss:$12 sps:$4 sm:$0xff]   ;;  %vm74_vm2 = vcmask 130048  }
  0x1e   :  { %328 = vmatprep.mubr.bf16.mxu1 %v2100_v0  ;;  %1669 = vmatprep.mubr.msk.bf16.mxu0 %vm2102_vm0, %v2101_v1  ;;  %v1867_v6 = vld [vmem:[#allocation2 + $0x94] ss:$12 sps:$4 sm:$0xff]   ;;  %v1869_v7 = vld [vmem:[#allocation2 + $0x90] ss:$12 sps:$4 sm:$0xff]   ;;  %v1873_v9 = vld [vmem:[#allocation2 + $0x78] ss:$12 sps:$4 sm:$0xff]  }
  0x1f   :  { %60 = vperm.xlu0 %1861, %v56_v2   ;;  %1668 = vmatpush3.bf16.msra.mxu0 %v1862_v3  ;;  %v1871_v8 = vld [vmem:[#allocation2 + $0x7c] ss:$12 sps:$4 sm:$0xff]   ;;  %v1875_v10 = vld [vmem:[#allocation2 + $0x64] ss:$12 sps:$4 sm:$0xff]   ;;  %v1877_v11 = vld [vmem:[#allocation2 + $0x60] ss:$12 sps:$4 sm:$0xff]  }
  0x20   :  { %296 = vmatprep.subr.bf16.mxu1 %v1863_v4  ;;  %1673 = vmatprep.subr.bf16.mxu0 %v2101_v1  ;;  %v1879_v12 = vld [vmem:[#allocation2 + $0x4c] ss:$12 sps:$4 sm:$0xff]   ;;  %v1881_v13 = vld [vmem:[#allocation2 + $0x48] ss:$12 sps:$4 sm:$0xff]   ;;  %v1885_v15 = vld [vmem:[#allocation2 + $0x30] ss:$12 sps:$4 sm:$0xff]  }
  0x21   :  { %297 = vmatpush1.bf16.msra.mxu1 %v1865_v5  ;;  %v1883_v14 = vld [vmem:[#allocation2 + $0x34] ss:$12 sps:$4 sm:$0xff]   ;;  %v1887_v16 = vld [vmem:[#allocation2 + $0x1c] ss:$12 sps:$4 sm:$0xff]   ;;  %v1889_v17 = vld [vmem:[#allocation2 + $0x18] ss:$12 sps:$4 sm:$0xff]  }
  0x22   :  { %298 = vmatprep.subr.bf16.mxu1 %v1867_v6  ;;  %v1891_v18 = vld [vmem:[#allocation2 + $0x4] ss:$12 sps:$4 sm:$0xff]   ;;  %v1893_v19 = vld [vmem:[#allocation2] ss:$12 sps:$4 sm:$0xff]   ;;  %v58_v21 = vand.u32 127, %v57_v20  ;;  %v154_v2 = vshrl.u32 %v57_v20, 7 }
  0x23   :  { %v1866_v24 = vld [vmem:[#allocation2 + $0xb0] ss:$12 sps:$4 sm:$0xff]   ;;  %v1870_v26 = vld [vmem:[#allocation2 + $0x98] ss:$12 sps:$4 sm:$0xff]   ;;  %v1874_v27 = vld [vmem:[#allocation2 + $0x80] ss:$12 sps:$4 sm:$0xff]  }
  0x24   :  { %v1878_v28 = vld [vmem:[#allocation2 + $0x68] ss:$12 sps:$4 sm:$0xff]   ;;  %v1882_v29 = vld [vmem:[#allocation2 + $0x50] ss:$12 sps:$4 sm:$0xff]   ;;  %v1886_v30 = vld [vmem:[#allocation2 + $0x38] ss:$12 sps:$4 sm:$0xff]  }
  0x25   :  { %299 = vmatpush1.bf16.msra.mxu1 %v1869_v7  ;;  %v1890_v31 = vld [vmem:[#allocation2 + $0x20] ss:$12 sps:$4 sm:$0xff]   ;;  %v1894_v32 = vld [vmem:[#allocation2 + $0x8] ss:$12 sps:$4 sm:$0xff]   ;;  %v2179_v36 = vld [vmem:[#allocation5 + $0xb0] ss:$12 sps:$4 sm:$0xff]  }
  0x26   :  { %300 = vmatprep.subr.bf16.mxu1 %v1871_v8  ;;  %v2173_v33 = vld [vmem:[#allocation5 + $0xac] ss:$12 sps:$4 sm:$0xff]   ;;  %v2177_v35 = vld [vmem:[#allocation5 + $0xa8] ss:$12 sps:$4 sm:$0xff]   ;;  %v2184_v41 = vld [vmem:[#allocation5 + $0x90] ss:$12 sps:$4 sm:$0xff]  }
  0x27   :  { %v2181_v38 = vld [vmem:[#allocation5 + $0x94] ss:$12 sps:$4 sm:$0xff]   ;;  %v2187_v42 = vld [vmem:[#allocation5 + $0x98] ss:$12 sps:$4 sm:$0xff]   ;;  %v2190_v43 = vld [vmem:[#allocation5 + $0x7c] ss:$12 sps:$4 sm:$0xff]  }
  0x28   :  { %v2197_v45 = vld [vmem:[#allocation5 + $0x78] ss:$12 sps:$4 sm:$0xff]   ;;  %v2200_v46 = vld [vmem:[#allocation5 + $0x80] ss:$12 sps:$4 sm:$0xff]   ;;  %v2210_v49 = vld [vmem:[#allocation5 + $0x68] ss:$12 sps:$4 sm:$0xff]  }
  0x29   :  { %301 = vmatpush1.bf16.msra.mxu1 %v1873_v9  ;;  %v2203_v47 = vld [vmem:[#allocation5 + $0x64] ss:$12 sps:$4 sm:$0xff]   ;;  %v2207_v48 = vld [vmem:[#allocation5 + $0x60] ss:$12 sps:$4 sm:$0xff]   ;;  %v2217_v51 = vld [vmem:[#allocation5 + $0x48] ss:$12 sps:$4 sm:$0xff]  }
  0x2a   :  { %302 = vmatprep.subr.bf16.mxu1 %v1875_v10  ;;  %v2213_v50 = vld [vmem:[#allocation5 + $0x4c] ss:$12 sps:$4 sm:$0xff]   ;;  %v2220_v52 = vld [vmem:[#allocation5 + $0x50] ss:$12 sps:$4 sm:$0xff]   ;;  %v2223_v53 = vld [vmem:[#allocation5 + $0x34] ss:$12 sps:$4 sm:$0xff]  }
  0x2b   :  { %v2227_v54 = vld [vmem:[#allocation5 + $0x30] ss:$12 sps:$4 sm:$0xff]   ;;  %v2230_v55 = vld [vmem:[#allocation5 + $0x38] ss:$12 sps:$4 sm:$0xff]   ;;  %v2240_v58 = vld [vmem:[#allocation5 + $0x20] ss:$12 sps:$4 sm:$0xff]  }
  0x2c   :  { %v2233_v56 = vld [vmem:[#allocation5 + $0x1c] ss:$12 sps:$4 sm:$0xff]   ;;  %v2237_v57 = vld [vmem:[#allocation5 + $0x18] ss:$12 sps:$4 sm:$0xff]   ;;  %v2247_v60 = vld [vmem:[#allocation5] ss:$12 sps:$4 sm:$0xff]  }
  0x2d   :  { %303 = vmatpush1.bf16.msra.mxu1 %v1877_v11  ;;  %v2243_v59 = vld [vmem:[#allocation5 + $0x4] ss:$12 sps:$4 sm:$0xff]   ;;  %v2252_v61 = vld [vmem:[%s2610_s6] sm:$0x1]  ;;  %v2255_v62 = vld [vmem:[#allocation5 + $0x8] ss:$12 sps:$4 sm:$0xff]  }
  0x2e   :  { %304 = vmatprep.subr.bf16.mxu1 %v1879_v12  ;;  %v411_v63 = vpack.c.bf16 %v2252_v61, %v2252_v61  ;;  %v163_v3 = vsub.s32 2, %v154_v2  ;;  %v151_v4 = vld [vmem:[%s2608_s4] sm:$0x7]  ;;  %vm1486_vm3 = vcmask 1040384   ;;  %vm1488_vm4 = vcmask 1041408   ;;  %s2103_s4 = smov [#allocation7]  }
  0x2f   :  { %vm1490_vm5 = vcmask 1042432   ;;  %vm1492_vm6 = vcmask 1043456   ;;  %vm1494_vm7 = vcmask 1044480   ;;  %vm1496_vm8 = vcmask 1045504  }
  0x30   :  { %v164_v5 = vrot.slane %v151_v4, %v163_v3  ;;  %vm1498_vm9 = vcmask 1046528  }
  0x31   :  { %305 = vmatpush1.bf16.msra.mxu1 %v1881_v13 }
  0x32   :  { %306 = vmatprep.subr.bf16.mxu1 %v1883_v14 }
  0x35   :  { %307 = vmatpush1.bf16.msra.mxu1 %v1885_v15  ;;  %v155_v15 = vsub.s32 0, %v154_v2 }
  0x36   :  { %308 = vmatprep.subr.bf16.mxu1 %v1887_v16  ;;  %v409_v16 = vld [vmem:[%s2609_s5] sm:$0x7]  ;;  %s1507_s5 = sshll.u32 %s2103_s4, 4  ;;  %s1508_s5 = int_to_ptr.vmem [resolvable:$true] %s1507_s5 }
  0x37   :  { %s2070_s18 = scalar_lea.vmem %s1508_s5, 128  ;;  %p2075_p11 = scmp.lt.s32.totalorder %s1508_s5, %s1508_s5 }
  0x38   :  { %p2071_p10 = scmp.ne.s32.totalorder %s1508_s5, %s2070_s18  ;;  %p2076_p12 = scmp.lt.s32.totalorder %s2070_s18, %s2070_s18 }
  0x39   :  { %309 = vmatpush1.bf16.msra.mxu1 %v1889_v17  ;;  %v156_v17 = vrot.slane %v151_v4, %v155_v15 }
  0x3a   :  { %310 = vmatprep.subr.bf16.mxu1 %v1891_v18  ;;  %v2309_v18 = vrot.slane %v409_v16, %v155_v15  ;;  %p2077_p13 = por %p2076_p12, %p2075_p11 }
  0x3c   :  { %p2078_p0 = pnand %p2077_p13, %p2071_p10 }
  0x3d   :  { %311 = vmatpush1.bf16.msra.mxu1 %v1893_v19  ;;  %v159_v19 = vsub.s32 1, %v154_v2 }
  0x3e   :  { %556 = vmatprep.subr.bf16.mxu1 %v2173_v33 }
  0x9a   :  { %v61_v22 = vpop.permute.xlu0 %60 }
  0x9b   :  { %vm62_vm1 = vcmp.eq.s32.totalorder %v58_v21, %v61_v22 }
  0x9c   :  { %v1517_v23 = vsel %vm62_vm1, 1.0, %v2101_v1 }
  0x9d   :  { %v65_v25 = vpack.c.bf16 %v1517_v23, %v1517_v23  ;;  %v2313_v23 = vrot.slane %v409_v16, %v159_v19 }
  0x9f   :  { %1670 = vmatmul.mubr.msk.bf16.vlgmr.msra.gmra.mxu0 %vm74_vm2, %v65_v25 }
  0xa0   :  { %1674 = vmatpush3.bf16.msra.mxu0 %v1866_v24  ;;  %1689 = vmatprep.mubr.msk.bf16.mxu0 %vm2102_vm0, %v2101_v1 }
  0xa1   :  { %1675 = vmatprep.subr.bf16.mxu0 %v2101_v1 }
  0xa4   :  { %1676 = vmatpush3.bf16.msra.mxu0 %v1870_v26 }
  0xa5   :  { %1677 = vmatprep.subr.bf16.mxu0 %v2101_v1 }
  0xa8   :  { %1678 = vmatpush3.bf16.msra.mxu0 %v1874_v27  ;;  %v160_v27 = vrot.slane %v151_v4, %v159_v19  ;;  %v2321_v4 = vrot.slane %v409_v16, %v163_v3 }
  0xa9   :  { %1679 = vmatprep.subr.bf16.mxu0 %v2101_v1 }
  0xac   :  { %1680 = vmatpush3.bf16.msra.mxu0 %v1878_v28 }
  0xad   :  { %1681 = vmatprep.subr.bf16.mxu0 %v2101_v1 }
  0xb0   :  { %1682 = vmatpush3.bf16.msra.mxu0 %v1882_v29 }
  0xb1   :  { %1683 = vmatprep.subr.bf16.mxu0 %v2101_v1 }
  0xb4   :  { %1684 = vmatpush3.bf16.msra.mxu0 %v1886_v30 }
  0xb5   :  { %1685 = vmatprep.subr.bf16.mxu0 %v2101_v1 }
  0xb8   :  { %1686 = vmatpush3.bf16.msra.mxu0 %v1890_v31 }
  0xb9   :  { %1687 = vmatprep.subr.bf16.mxu0 %v2101_v1 }
  0xbc   :  { %1688 = vmatpush3.bf16.msra.mxu0 %v1894_v32 }
  0xbd   :  { %1693 = vmatprep.subr.bf16.mxu0 %v2101_v1 }
 0x15f   :  { %v112_v34 = vpop.f32.mrf.mxu0 }
 0x160   :  { %v118_v37 = vpack.c.bf16 %v112_v34, %v112_v34 }
 0x161   :  { %v1671_v39 = vpop.f32.mrf.mxu0 }
 0x162   :  { %329 = vmatmul.mubr.bf16.vlgmr.msra.gmra.mxu1 %v118_v37  ;;  %1690 = vmatmul.mubr.bf16.vlgmr.msra.gmra.mxu0 %v118_v37 }
 0x163   :  { %557 = vmatpush1.bf16.msra.mxu1 %v2177_v35  ;;  %v115_v40 = vpop.f32.mrf.mxu0  ;;  %1694 = vmatpush3.bf16.msra.mxu0 %v2179_v36 }
 0x164   :  { %558 = vmatprep.subr.bf16.mxu1 %v2181_v38  ;;  %588 = vmatprep.mubr.bf16.mxu1 %v2100_v0 }
 0x165   :  { %v1672_v44 = vpop.f32.mrf.mxu0  ;;  %1695 = vmatprep.subr.bf16.mxu0 %v2101_v1  ;;  %1709 = vmatprep.mubr.msk.bf16.mxu0 %vm2102_vm0, %v2101_v1 }
 0x167   :  { %559 = vmatpush1.bf16.msra.mxu1 %v2184_v41  ;;  %1696 = vmatpush3.bf16.msra.mxu0 %v2187_v42 }
 0x168   :  { %560 = vmatprep.subr.bf16.mxu1 %v2190_v43  ;;  %1697 = vmatprep.subr.bf16.mxu0 %v2101_v1 }
 0x16b   :  { %561 = vmatpush1.bf16.msra.mxu1 %v2197_v45  ;;  %1698 = vmatpush3.bf16.msra.mxu0 %v2200_v46 }
 0x16c   :  { %562 = vmatprep.subr.bf16.mxu1 %v2203_v47  ;;  %1699 = vmatprep.subr.bf16.mxu0 %v2101_v1 }
 0x16f   :  { %563 = vmatpush1.bf16.msra.mxu1 %v2207_v48  ;;  %1700 = vmatpush3.bf16.msra.mxu0 %v2210_v49 }
 0x170   :  { %564 = vmatprep.subr.bf16.mxu1 %v2213_v50  ;;  %1701 = vmatprep.subr.bf16.mxu0 %v2101_v1 }
 0x173   :  { %565 = vmatpush1.bf16.msra.mxu1 %v2217_v51  ;;  %1702 = vmatpush3.bf16.msra.mxu0 %v2220_v52 }
 0x174   :  { %566 = vmatprep.subr.bf16.mxu1 %v2223_v53  ;;  %1703 = vmatprep.subr.bf16.mxu0 %v2101_v1 }
 0x177   :  { %567 = vmatpush1.bf16.msra.mxu1 %v2227_v54  ;;  %1704 = vmatpush3.bf16.msra.mxu0 %v2230_v55 }
 0x178   :  { %568 = vmatprep.subr.bf16.mxu1 %v2233_v56  ;;  %1705 = vmatprep.subr.bf16.mxu0 %v2101_v1 }
 0x17b   :  { %569 = vmatpush1.bf16.msra.mxu1 %v2237_v57  ;;  %1706 = vmatpush3.bf16.msra.mxu0 %v2240_v58 }
 0x17c   :  { %570 = vmatprep.subr.bf16.mxu1 %v2243_v59  ;;  %1707 = vmatprep.subr.bf16.mxu0 %v2101_v1 }
 0x17f   :  { %571 = vmatpush1.bf16.msra.mxu1 %v2247_v60  ;;  %1708 = vmatpush3.bf16.msra.mxu0 %v2255_v62 }
 0x180   :  { %659 = vmatprep.subr.bf16.mxu1 %v2173_v33  ;;  %1713 = vmatprep.subr.bf16.mxu0 %v2101_v1 }
 0x182   :  { %589 = vmatmul.mubr.bf16.vlgmr.msra.gmra.mxu1 %v411_v63  ;;  %1710 = vmatmul.mubr.bf16.vlgmr.msra.gmra.mxu0 %v411_v63 }
 0x183   :  { %660 = vmatpush1.bf16.msra.mxu1 %v2177_v35  ;;  %1714 = vmatpush3.bf16.msra.mxu0 %v2179_v36 }
 0x184   :  { %661 = vmatprep.subr.bf16.mxu1 %v2181_v38  ;;  %1715 = vmatprep.subr.bf16.mxu0 %v2101_v1 }
 0x185   :  { %691 = vmatprep.mubr.bf16.mxu1 %v2100_v0  ;;  %1729 = vmatprep.mubr.msk.bf16.mxu0 %vm2102_vm0, %v2101_v1 }
 0x187   :  { %662 = vmatpush1.bf16.msra.mxu1 %v2184_v41  ;;  %1716 = vmatpush3.bf16.msra.mxu0 %v2187_v42 }
 0x188   :  { %663 = vmatprep.subr.bf16.mxu1 %v2190_v43  ;;  %1717 = vmatprep.subr.bf16.mxu0 %v2101_v1 }
 0x18b   :  { %664 = vmatpush1.bf16.msra.mxu1 %v2197_v45  ;;  %1718 = vmatpush3.bf16.msra.mxu0 %v2200_v46 }
 0x18c   :  { %665 = vmatprep.subr.bf16.mxu1 %v2203_v47  ;;  %1719 = vmatprep.subr.bf16.mxu0 %v2101_v1 }
 0x18f   :  { %666 = vmatpush1.bf16.msra.mxu1 %v2207_v48  ;;  %1720 = vmatpush3.bf16.msra.mxu0 %v2210_v49 }
 0x190   :  { %667 = vmatprep.subr.bf16.mxu1 %v2213_v50  ;;  %1721 = vmatprep.subr.bf16.mxu0 %v2101_v1 }
 0x193   :  { %668 = vmatpush1.bf16.msra.mxu1 %v2217_v51  ;;  %1722 = vmatpush3.bf16.msra.mxu0 %v2220_v52 }
 0x194   :  { %669 = vmatprep.subr.bf16.mxu1 %v2223_v53  ;;  %1723 = vmatprep.subr.bf16.mxu0 %v2101_v1 }
 0x197   :  { %670 = vmatpush1.bf16.msra.mxu1 %v2227_v54  ;;  %1724 = vmatpush3.bf16.msra.mxu0 %v2230_v55 }
 0x198   :  { %671 = vmatprep.subr.bf16.mxu1 %v2233_v56  ;;  %1725 = vmatprep.subr.bf16.mxu0 %v2101_v1 }
 0x19b   :  { %672 = vmatpush1.bf16.msra.mxu1 %v2237_v57  ;;  %1726 = vmatpush3.bf16.msra.mxu0 %v2240_v58 }
 0x19c   :  { %673 = vmatprep.subr.bf16.mxu1 %v2243_v59  ;;  %1727 = vmatprep.subr.bf16.mxu0 %v2101_v1 }
 0x19f   :  { %674 = vmatpush1.bf16.msra.mxu1 %v2247_v60  ;;  %1728 = vmatpush3.bf16.msra.mxu0 %v2255_v62 }
 0x1a0   :  { %778 = vmatprep.subr.bf16.mxu1 %v2173_v33  ;;  %1733 = vmatprep.subr.bf16.mxu0 %v2101_v1 }
 0x222   :  { %v330_v6 = vpop.f32.mrf.mxu1  ;;  %v371_v7 = vpop.f32.mrf.mxu0 }
 0x223   :  { %v2304_v8 = vadd.f32 %v371_v7, %v164_v5  ;;  %v2311_v22 = vadd.f32 %v330_v6, %v156_v17 }
 0x224   :  { %v332_v9 = vpop.f32.mrf.mxu1  ;;  %v1691_v10 = vpop.f32.mrf.mxu0 }
 0x225   :  { %v2318_v39 = vadd.f32 %v332_v9, %v160_v27 }
 0x226   :  { %v334_v11 = vpop.f32.mrf.mxu1  ;;  %v374_v12 = vpop.f32.mrf.mxu0 }
 0x228   :  { %v335_v13 = vpop.f32.mrf.mxu1  ;;  %v1692_v14 = vpop.f32.mrf.mxu0 }
 0x242   :  { %v590_v20 = vpop.f32.mrf.mxu1  ;;  %v631_v21 = vpop.f32.mrf.mxu0 }
 0x243   :  { %v591_v24 = vadd.f32 %v590_v20, %v2309_v18  ;;  %v632_v7 = vadd.f32 %v631_v21, %v2321_v4 }
 0x244   :  { %v592_v25 = vpop.f32.mrf.mxu1  ;;  %v1711_v26 = vpop.f32.mrf.mxu0 }
 0x245   :  { %v637_v28 = vadd.f32 %v591_v24, %v2311_v22  ;;  %v593_v32 = vadd.f32 %v592_v25, %v2313_v23 }
 0x246   :  { %v594_v29 = vpop.f32.mrf.mxu1  ;;  %v634_v30 = vpop.f32.mrf.mxu0 }
 0x247   :  { %v1568_v31 = vmul.f32 -1.442695, %v637_v28  ;;  %v644_v40 = vadd.f32 %v593_v32, %v2318_v39 }
 0x248   :  { %v595_v34 = vpop.f32.mrf.mxu1  ;;  %v1712_v37 = vpop.f32.mrf.mxu0 }
 0x249   :  { %1927 = vpow2.f32 %v1568_v31  ;;  %v1569_v44 = vmul.f32 -1.442695, %v644_v40 }
 0x24b   :  { %1929 = vpow2.f32 %v1569_v44 }
 0x256   :  { %v1928_v63 = vpop.eup %1927 }
 0x257   :  { %v641_v2 = vadd.f32 1.0, %v1928_v63 }
 0x258   :  { %v1930_v5 = vpop.eup %1929 }
 0x259   :  { %1931 = vrcp.f32 %v641_v2  ;;  %v648_v6 = vadd.f32 1.0, %v1930_v5 }
 0x25b   :  { %1933 = vrcp.f32 %v648_v6 }
 0x266   :  { %v1932_v10 = vpop.eup %1931 }
 0x267   :  { %v651_v11 = vmul.f32 %v1932_v10, %v632_v7 }
 0x268   :  { %v1934_v12 = vpop.eup %1933 }
 0x269   :  { %v652_v9 = vadd.f32 %v651_v11, %v2304_v8  ;;  %v654_v13 = vsub.f32 1.0, %v1934_v12  ;;  %v656_v17 = vmul.f32 %v1934_v12, %v2252_v61 }
 0x26b   :  { %1935 = vtanh.f32 %v652_v9 }
 0x278   :  { %v1936_v14 = vpop.eup %1935 }
 0x279   :  { %v655_v15 = vmul.f32 %v1936_v14, %v654_v13 }
 0x27b   :  { %v2326_v19 = vadd.f32 %v656_v17, %v655_v15 }
 0x27d   :  { %v658_v3 = vpack.c.bf16 %v2326_v19, %v2326_v19  ;;  %v769_v14 = vrot.slane %v2326_v19, 7 }
 0x27f   :  { %692 = vmatmul.mubr.bf16.vlgmr.msra.gmra.mxu1 %v658_v3  ;;  %1730 = vmatmul.mubr.bf16.vlgmr.msra.gmra.mxu0 %v658_v3 }
 0x280   :  { %779 = vmatpush1.bf16.msra.mxu1 %v2177_v35  ;;  %1734 = vmatpush3.bf16.msra.mxu0 %v2179_v36 }
 0x281   :  { %780 = vmatprep.subr.bf16.mxu1 %v2181_v38  ;;  %1735 = vmatprep.subr.bf16.mxu0 %v2101_v1 }
 0x282   :  { %810 = vmatprep.mubr.bf16.mxu1 %v2100_v0  ;;  %1749 = vmatprep.mubr.msk.bf16.mxu0 %vm2102_vm0, %v2101_v1 }
 0x284   :  { %781 = vmatpush1.bf16.msra.mxu1 %v2184_v41  ;;  %1736 = vmatpush3.bf16.msra.mxu0 %v2187_v42 }
 0x285   :  { %782 = vmatprep.subr.bf16.mxu1 %v2190_v43  ;;  %1737 = vmatprep.subr.bf16.mxu0 %v2101_v1 }
 0x288   :  { %783 = vmatpush1.bf16.msra.mxu1 %v2197_v45  ;;  %1738 = vmatpush3.bf16.msra.mxu0 %v2200_v46 }
 0x289   :  { %784 = vmatprep.subr.bf16.mxu1 %v2203_v47  ;;  %1739 = vmatprep.subr.bf16.mxu0 %v2101_v1 }
 0x28c   :  { %785 = vmatpush1.bf16.msra.mxu1 %v2207_v48  ;;  %1740 = vmatpush3.bf16.msra.mxu0 %v2210_v49 }
 0x28d   :  { %786 = vmatprep.subr.bf16.mxu1 %v2213_v50  ;;  %1741 = vmatprep.subr.bf16.mxu0 %v2101_v1 }
 0x290   :  { %787 = vmatpush1.bf16.msra.mxu1 %v2217_v51  ;;  %1742 = vmatpush3.bf16.msra.mxu0 %v2220_v52 }
 0x291   :  { %788 = vmatprep.subr.bf16.mxu1 %v2223_v53  ;;  %1743 = vmatprep.subr.bf16.mxu0 %v2101_v1 }
 0x294   :  { %789 = vmatpush1.bf16.msra.mxu1 %v2227_v54  ;;  %1744 = vmatpush3.bf16.msra.mxu0 %v2230_v55 }
 0x295   :  { %790 = vmatprep.subr.bf16.mxu1 %v2233_v56  ;;  %1745 = vmatprep.subr.bf16.mxu0 %v2101_v1 }
 0x298   :  { %791 = vmatpush1.bf16.msra.mxu1 %v2237_v57  ;;  %1746 = vmatpush3.bf16.msra.mxu0 %v2240_v58 }
 0x299   :  { %792 = vmatprep.subr.bf16.mxu1 %v2243_v59  ;;  %1747 = vmatprep.subr.bf16.mxu0 %v2101_v1 }
 0x29c   :  { %793 = vmatpush1.bf16.msra.mxu1 %v2247_v60  ;;  %1748 = vmatpush3.bf16.msra.mxu0 %v2255_v62 }
 0x29d   :  { %896 = vmatprep.subr.bf16.mxu1 %v2173_v33  ;;  %1753 = vmatprep.subr.bf16.mxu0 %v2101_v1 }
 0x33f   :  { %v693_v61 = vpop.f32.mrf.mxu1  ;;  %v734_v16 = vpop.f32.mrf.mxu0 }
 0x340   :  { %v694_v20 = vadd.f32 %v693_v61, %v2309_v18  ;;  %v735_v5 = vadd.f32 %v734_v16, %v2321_v4 }
 0x341   :  { %v695_v21 = vpop.f32.mrf.mxu1  ;;  %v1731_v24 = vpop.f32.mrf.mxu0 }
 0x342   :  { %v741_v25 = vrot.slane %v694_v20, 7  ;;  %v696_v26 = vadd.f32 %v695_v21, %v2313_v23  ;;  %v761_v7 = vrot.slane %v735_v5, 7 }
 0x343   :  { %v697_v27 = vpop.f32.mrf.mxu1  ;;  %v737_v28 = vpop.f32.mrf.mxu0 }
 0x344   :  { %v743_v29 = vadd.f32 %v741_v25, %v2311_v22  ;;  %v751_v34 = vrot.slane %v696_v26, 7 }
 0x345   :  { %v698_v30 = vpop.f32.mrf.mxu1  ;;  %v1732_v31 = vpop.f32.mrf.mxu0 }
 0x346   :  { %v1570_v32 = vmul.f32 -1.442695, %v743_v29  ;;  %v753_v37 = vadd.f32 %v751_v34, %v2318_v39 }
 0x348   :  { %1937 = vpow2.f32 %v1570_v32  ;;  %v1571_v40 = vmul.f32 -1.442695, %v753_v37 }
 0x34a   :  { %1939 = vpow2.f32 %v1571_v40 }
 0x355   :  { %v1938_v44 = vpop.eup %1937 }
 0x356   :  { %v747_v63 = vadd.f32 1.0, %v1938_v44 }
 0x357   :  { %v1940_v2 = vpop.eup %1939 }
 0x358   :  { %1941 = vrcp.f32 %v747_v63  ;;  %v757_v6 = vadd.f32 1.0, %v1940_v2 }
 0x35a   :  { %1943 = vrcp.f32 %v757_v6 }
 0x365   :  { %v1942_v10 = vpop.eup %1941 }
 0x366   :  { %v763_v11 = vmul.f32 %v1942_v10, %v761_v7 }
 0x367   :  { %v1944_v12 = vpop.eup %1943 }
 0x368   :  { %v764_v9 = vadd.f32 %v763_v11, %v2304_v8  ;;  %v766_v13 = vsub.f32 1.0, %v1944_v12  ;;  %v771_v3 = vmul.f32 %v1944_v12, %v769_v14 }
 0x36a   :  { %1945 = vtanh.f32 %v764_v9 }
 0x377   :  { %v1946_v15 = vpop.eup %1945 }
 0x378   :  { %v767_v17 = vmul.f32 %v1946_v15, %v766_v13 }
 0x37a   :  { %v2372_v61 = vadd.f32 %v771_v3, %v767_v17 }
 0x37c   :  { %v773_v16 = vpack.c.bf16 %v2372_v61, %v2372_v61  ;;  %v888_v3 = vrot.slane %v2372_v61, 7 }
 0x37e   :  { %v775_v20 = vshrl.u32 %v773_v16, 16 }
 0x380   :  { %811 = vmatmul.mubr.bf16.vlgmr.msra.gmra.mxu1 %v775_v20  ;;  %1750 = vmatmul.mubr.bf16.vlgmr.msra.gmra.mxu0 %v775_v20 }
 0x381   :  { %897 = vmatpush1.bf16.msra.mxu1 %v2177_v35  ;;  %1754 = vmatpush3.bf16.msra.mxu0 %v2179_v36 }
 0x382   :  { %898 = vmatprep.subr.bf16.mxu1 %v2181_v38  ;;  %1755 = vmatprep.subr.bf16.mxu0 %v2101_v1 }
 0x383   :  { %928 = vmatprep.mubr.bf16.mxu1 %v2100_v0  ;;  %1769 = vmatprep.mubr.msk.bf16.mxu0 %vm2102_vm0, %v2101_v1 }
 0x385   :  { %899 = vmatpush1.bf16.msra.mxu1 %v2184_v41  ;;  %1756 = vmatpush3.bf16.msra.mxu0 %v2187_v42 }
 0x386   :  { %900 = vmatprep.subr.bf16.mxu1 %v2190_v43  ;;  %1757 = vmatprep.subr.bf16.mxu0 %v2101_v1 }
 0x389   :  { %901 = vmatpush1.bf16.msra.mxu1 %v2197_v45  ;;  %1758 = vmatpush3.bf16.msra.mxu0 %v2200_v46 }
 0x38a   :  { %902 = vmatprep.subr.bf16.mxu1 %v2203_v47  ;;  %1759 = vmatprep.subr.bf16.mxu0 %v2101_v1 }
 0x38d   :  { %903 = vmatpush1.bf16.msra.mxu1 %v2207_v48  ;;  %1760 = vmatpush3.bf16.msra.mxu0 %v2210_v49 }
 0x38e   :  { %904 = vmatprep.subr.bf16.mxu1 %v2213_v50  ;;  %1761 = vmatprep.subr.bf16.mxu0 %v2101_v1 }
 0x391   :  { %905 = vmatpush1.bf16.msra.mxu1 %v2217_v51  ;;  %1762 = vmatpush3.bf16.msra.mxu0 %v2220_v52 }
 0x392   :  { %906 = vmatprep.subr.bf16.mxu1 %v2223_v53  ;;  %1763 = vmatprep.subr.bf16.mxu0 %v2101_v1 }
 0x395   :  { %907 = vmatpush1.bf16.msra.mxu1 %v2227_v54  ;;  %1764 = vmatpush3.bf16.msra.mxu0 %v2230_v55 }
 0x396   :  { %908 = vmatprep.subr.bf16.mxu1 %v2233_v56  ;;  %1765 = vmatprep.subr.bf16.mxu0 %v2101_v1 }
 0x399   :  { %909 = vmatpush1.bf16.msra.mxu1 %v2237_v57  ;;  %1766 = vmatpush3.bf16.msra.mxu0 %v2240_v58 }
 0x39a   :  { %910 = vmatprep.subr.bf16.mxu1 %v2243_v59  ;;  %1767 = vmatprep.subr.bf16.mxu0 %v2101_v1 }
 0x39d   :  { %911 = vmatpush1.bf16.msra.mxu1 %v2247_v60  ;;  %1768 = vmatpush3.bf16.msra.mxu0 %v2255_v62 }
 0x39e   :  { %1016 = vmatprep.subr.bf16.mxu1 %v2173_v33  ;;  %1773 = vmatprep.subr.bf16.mxu0 %v2101_v1 }
 0x440   :  { %v812_v21 = vpop.f32.mrf.mxu1  ;;  %v853_v24 = vpop.f32.mrf.mxu0 }
 0x441   :  { %v813_v25 = vadd.f32 %v812_v21, %v2309_v18  ;;  %v854_v10 = vadd.f32 %v853_v24, %v2321_v4  ;;  %v1487_v24 = vsel %vm1486_vm3, %v2326_v19, %v2372_v61 }
 0x442   :  { %v814_v26 = vpop.f32.mrf.mxu1  ;;  %v1751_v27 = vpop.f32.mrf.mxu0 }
 0x443   :  { %v860_v28 = vrot.slane %v813_v25, 6  ;;  %v815_v29 = vadd.f32 %v814_v26, %v2313_v23  ;;  %v880_v9 = vrot.slane %v854_v10, 6 }
 0x444   :  { %v816_v30 = vpop.f32.mrf.mxu1  ;;  %v856_v31 = vpop.f32.mrf.mxu0 }
 0x445   :  { %v862_v32 = vadd.f32 %v860_v28, %v2311_v22  ;;  %v870_v44 = vrot.slane %v815_v29, 6 }
 0x446   :  { %v817_v34 = vpop.f32.mrf.mxu1  ;;  %v1752_v37 = vpop.f32.mrf.mxu0 }
 0x447   :  { %v1572_v40 = vmul.f32 -1.442695, %v862_v32  ;;  %v872_v63 = vadd.f32 %v870_v44, %v2318_v39 }
 0x449   :  { %1947 = vpow2.f32 %v1572_v40  ;;  %v1573_v2 = vmul.f32 -1.442695, %v872_v63 }
 0x44b   :  { %1949 = vpow2.f32 %v1573_v2 }
 0x456   :  { %v1948_v5 = vpop.eup %1947 }
 0x457   :  { %v866_v6 = vadd.f32 1.0, %v1948_v5 }
 0x458   :  { %v1950_v7 = vpop.eup %1949 }
 0x459   :  { %1951 = vrcp.f32 %v866_v6  ;;  %v876_v11 = vadd.f32 1.0, %v1950_v7 }
 0x45b   :  { %1953 = vrcp.f32 %v876_v11 }
 0x466   :  { %v1952_v12 = vpop.eup %1951 }
 0x467   :  { %v882_v13 = vmul.f32 %v1952_v12, %v880_v9 }
 0x468   :  { %v1954_v15 = vpop.eup %1953 }
 0x469   :  { %v883_v14 = vadd.f32 %v882_v13, %v2304_v8  ;;  %v885_v17 = vsub.f32 1.0, %v1954_v15  ;;  %v890_v21 = vmul.f32 %v1954_v15, %v888_v3 }
 0x46b   :  { %1955 = vtanh.f32 %v883_v14 }
 0x478   :  { %v1956_v16 = vpop.eup %1955 }
 0x479   :  { %v886_v20 = vmul.f32 %v1956_v16, %v885_v17 }
 0x47b   :  { %v2418_v25 = vadd.f32 %v890_v21, %v886_v20 }
 0x47d   :  { %v892_v26 = vpack.c.bf16 %v2418_v25, %v2418_v25  ;;  %v2425_v27 = vsel %vm1488_vm4, %v1487_v24, %v2418_v25  ;;  %v1006_v24 = vrot.slane %v2418_v25, 7 }
 0x47f   :  { %v894_v28 = vrot.slane %v892_v26, 1 }
 0x481   :  { %929 = vmatmul.mubr.bf16.vlgmr.msra.gmra.mxu1 %v894_v28  ;;  %1770 = vmatmul.mubr.bf16.vlgmr.msra.gmra.mxu0 %v894_v28 }
 0x482   :  { %1017 = vmatpush1.bf16.msra.mxu1 %v2177_v35  ;;  %1774 = vmatpush3.bf16.msra.mxu0 %v2179_v36 }
 0x483   :  { %1018 = vmatprep.subr.bf16.mxu1 %v2181_v38  ;;  %1775 = vmatprep.subr.bf16.mxu0 %v2101_v1 }
 0x484   :  { %1048 = vmatprep.mubr.bf16.mxu1 %v2100_v0  ;;  %1789 = vmatprep.mubr.msk.bf16.mxu0 %vm2102_vm0, %v2101_v1 }
 0x486   :  { %1019 = vmatpush1.bf16.msra.mxu1 %v2184_v41  ;;  %1776 = vmatpush3.bf16.msra.mxu0 %v2187_v42 }
 0x487   :  { %1020 = vmatprep.subr.bf16.mxu1 %v2190_v43  ;;  %1777 = vmatprep.subr.bf16.mxu0 %v2101_v1 }
 0x48a   :  { %1021 = vmatpush1.bf16.msra.mxu1 %v2197_v45  ;;  %1778 = vmatpush3.bf16.msra.mxu0 %v2200_v46 }
 0x48b   :  { %1022 = vmatprep.subr.bf16.mxu1 %v2203_v47  ;;  %1779 = vmatprep.subr.bf16.mxu0 %v2101_v1 }
 0x48e   :  { %1023 = vmatpush1.bf16.msra.mxu1 %v2207_v48  ;;  %1780 = vmatpush3.bf16.msra.mxu0 %v2210_v49 }
 0x48f   :  { %1024 = vmatprep.subr.bf16.mxu1 %v2213_v50  ;;  %1781 = vmatprep.subr.bf16.mxu0 %v2101_v1 }
 0x492   :  { %1025 = vmatpush1.bf16.msra.mxu1 %v2217_v51  ;;  %1782 = vmatpush3.bf16.msra.mxu0 %v2220_v52 }
 0x493   :  { %1026 = vmatprep.subr.bf16.mxu1 %v2223_v53  ;;  %1783 = vmatprep.subr.bf16.mxu0 %v2101_v1 }
 0x496   :  { %1027 = vmatpush1.bf16.msra.mxu1 %v2227_v54  ;;  %1784 = vmatpush3.bf16.msra.mxu0 %v2230_v55 }
 0x497   :  { %1028 = vmatprep.subr.bf16.mxu1 %v2233_v56  ;;  %1785 = vmatprep.subr.bf16.mxu0 %v2101_v1 }
 0x49a   :  { %1029 = vmatpush1.bf16.msra.mxu1 %v2237_v57  ;;  %1786 = vmatpush3.bf16.msra.mxu0 %v2240_v58 }
 0x49b   :  { %1030 = vmatprep.subr.bf16.mxu1 %v2243_v59  ;;  %1787 = vmatprep.subr.bf16.mxu0 %v2101_v1 }
 0x49e   :  { %1031 = vmatpush1.bf16.msra.mxu1 %v2247_v60  ;;  %1788 = vmatpush3.bf16.msra.mxu0 %v2255_v62 }
 0x49f   :  { %1134 = vmatprep.subr.bf16.mxu1 %v2173_v33  ;;  %1793 = vmatprep.subr.bf16.mxu0 %v2101_v1 }
 0x541   :  { %v930_v19 = vpop.f32.mrf.mxu1  ;;  %v971_v61 = vpop.f32.mrf.mxu0 }
 0x542   :  { %v931_v29 = vadd.f32 %v930_v19, %v2309_v18  ;;  %v972_v13 = vadd.f32 %v971_v61, %v2321_v4 }
 0x543   :  { %v932_v30 = vpop.f32.mrf.mxu1  ;;  %v1771_v31 = vpop.f32.mrf.mxu0 }
 0x544   :  { %v978_v32 = vrot.slane %v931_v29, 5  ;;  %v933_v34 = vadd.f32 %v932_v30, %v2313_v23  ;;  %v998_v15 = vrot.slane %v972_v13, 5 }
 0x545   :  { %v934_v37 = vpop.f32.mrf.mxu1  ;;  %v974_v40 = vpop.f32.mrf.mxu0 }
 0x546   :  { %v980_v44 = vadd.f32 %v978_v32, %v2311_v22  ;;  %v988_v6 = vrot.slane %v933_v34, 5 }
 0x547   :  { %v935_v63 = vpop.f32.mrf.mxu1  ;;  %v1772_v2 = vpop.f32.mrf.mxu0 }
 0x548   :  { %v1574_v5 = vmul.f32 -1.442695, %v980_v44  ;;  %v990_v7 = vadd.f32 %v988_v6, %v2318_v39 }
 0x54a   :  { %1957 = vpow2.f32 %v1574_v5  ;;  %v1575_v10 = vmul.f32 -1.442695, %v990_v7 }
 0x54c   :  { %1959 = vpow2.f32 %v1575_v10 }
 0x557   :  { %v1958_v11 = vpop.eup %1957 }
 0x558   :  { %v984_v9 = vadd.f32 1.0, %v1958_v11 }
 0x559   :  { %v1960_v12 = vpop.eup %1959 }
 0x55a   :  { %1961 = vrcp.f32 %v984_v9  ;;  %v994_v14 = vadd.f32 1.0, %v1960_v12 }
 0x55c   :  { %1963 = vrcp.f32 %v994_v14 }
 0x567   :  { %v1962_v17 = vpop.eup %1961 }
 0x568   :  { %v1000_v3 = vmul.f32 %v1962_v17, %v998_v15 }
 0x569   :  { %v1964_v20 = vpop.eup %1963 }
 0x56a   :  { %v1001_v16 = vadd.f32 %v1000_v3, %v2304_v8  ;;  %v1003_v21 = vsub.f32 1.0, %v1964_v20  ;;  %v1008_v19 = vmul.f32 %v1964_v20, %v1006_v24 }
 0x56c   :  { %1965 = vtanh.f32 %v1001_v16 }
 0x579   :  { %v1966_v26 = vpop.eup %1965 }
 0x57a   :  { %v1004_v28 = vmul.f32 %v1966_v26, %v1003_v21 }
 0x57c   :  { %v2469_v29 = vadd.f32 %v1008_v19, %v1004_v28 }
 0x57e   :  { %v1010_v61 = vpack.c.bf16 %v2469_v29, %v2469_v29  ;;  %v2475_v30 = vsel %vm1490_vm5, %v2425_v27, %v2469_v29 }
 0x580   :  { %v1012_v31 = vshrl.u32 %v1010_v61, 16  ;;  %v1126_v61 = vrot.slane %v2469_v29, 7 }
 0x582   :  { %v1014_v32 = vrot.slane %v1012_v31, 1 }
 0x584   :  { %1049 = vmatmul.mubr.bf16.vlgmr.msra.gmra.mxu1 %v1014_v32  ;;  %1790 = vmatmul.mubr.bf16.vlgmr.msra.gmra.mxu0 %v1014_v32 }
 0x585   :  { %1135 = vmatpush1.bf16.msra.mxu1 %v2177_v35  ;;  %1794 = vmatpush3.bf16.msra.mxu0 %v2179_v36 }
 0x586   :  { %1136 = vmatprep.subr.bf16.mxu1 %v2181_v38  ;;  %1795 = vmatprep.subr.bf16.mxu0 %v2101_v1 }
 0x587   :  { %1166 = vmatprep.mubr.bf16.mxu1 %v2100_v0  ;;  %1809 = vmatprep.mubr.msk.bf16.mxu0 %vm2102_vm0, %v2101_v1 }
 0x589   :  { %1137 = vmatpush1.bf16.msra.mxu1 %v2184_v41  ;;  %1796 = vmatpush3.bf16.msra.mxu0 %v2187_v42 }
 0x58a   :  { %1138 = vmatprep.subr.bf16.mxu1 %v2190_v43  ;;  %1797 = vmatprep.subr.bf16.mxu0 %v2101_v1 }
 0x58d   :  { %1139 = vmatpush1.bf16.msra.mxu1 %v2197_v45  ;;  %1798 = vmatpush3.bf16.msra.mxu0 %v2200_v46 }
 0x58e   :  { %1140 = vmatprep.subr.bf16.mxu1 %v2203_v47  ;;  %1799 = vmatprep.subr.bf16.mxu0 %v2101_v1 }
 0x591   :  { %1141 = vmatpush1.bf16.msra.mxu1 %v2207_v48  ;;  %1800 = vmatpush3.bf16.msra.mxu0 %v2210_v49 }
 0x592   :  { %1142 = vmatprep.subr.bf16.mxu1 %v2213_v50  ;;  %1801 = vmatprep.subr.bf16.mxu0 %v2101_v1 }
 0x595   :  { %1143 = vmatpush1.bf16.msra.mxu1 %v2217_v51  ;;  %1802 = vmatpush3.bf16.msra.mxu0 %v2220_v52 }
 0x596   :  { %1144 = vmatprep.subr.bf16.mxu1 %v2223_v53  ;;  %1803 = vmatprep.subr.bf16.mxu0 %v2101_v1 }
 0x599   :  { %1145 = vmatpush1.bf16.msra.mxu1 %v2227_v54  ;;  %1804 = vmatpush3.bf16.msra.mxu0 %v2230_v55 }
 0x59a   :  { %1146 = vmatprep.subr.bf16.mxu1 %v2233_v56  ;;  %1805 = vmatprep.subr.bf16.mxu0 %v2101_v1 }
 0x59d   :  { %1147 = vmatpush1.bf16.msra.mxu1 %v2237_v57  ;;  %1806 = vmatpush3.bf16.msra.mxu0 %v2240_v58 }
 0x59e   :  { %1148 = vmatprep.subr.bf16.mxu1 %v2243_v59  ;;  %1807 = vmatprep.subr.bf16.mxu0 %v2101_v1 }
 0x5a1   :  { %1149 = vmatpush1.bf16.msra.mxu1 %v2247_v60  ;;  %1808 = vmatpush3.bf16.msra.mxu0 %v2255_v62 }
 0x5a2   :  { %1254 = vmatprep.subr.bf16.mxu1 %v2173_v33  ;;  %1813 = vmatprep.subr.bf16.mxu0 %v2101_v1 }
 0x644   :  { %v1050_v25 = vpop.f32.mrf.mxu1  ;;  %v1091_v27 = vpop.f32.mrf.mxu0 }
 0x645   :  { %v1051_v34 = vadd.f32 %v1050_v25, %v2309_v18  ;;  %v1092_v3 = vadd.f32 %v1091_v27, %v2321_v4 }
 0x646   :  { %v1052_v37 = vpop.f32.mrf.mxu1  ;;  %v1791_v40 = vpop.f32.mrf.mxu0 }
 0x647   :  { %v1098_v44 = vrot.slane %v1051_v34, 4  ;;  %v1053_v63 = vadd.f32 %v1052_v37, %v2313_v23  ;;  %v1118_v20 = vrot.slane %v1092_v3, 4  ;;  %v2011_v3 = vld [vmem:[#allocation5 + $0x98] ss:$12 sps:$4 sm:$0xff]  }
 0x648   :  { %v1054_v2 = vpop.f32.mrf.mxu1  ;;  %v1094_v5 = vpop.f32.mrf.mxu0 }
 0x649   :  { %v1100_v6 = vadd.f32 %v1098_v44, %v2311_v22  ;;  %v1108_v9 = vrot.slane %v1053_v63, 4 }
 0x64a   :  { %v1055_v7 = vpop.f32.mrf.mxu1  ;;  %v1792_v10 = vpop.f32.mrf.mxu0 }
 0x64b   :  { %v1576_v11 = vmul.f32 -1.442695, %v1100_v6  ;;  %v1110_v12 = vadd.f32 %v1108_v9, %v2318_v39 }
 0x64d   :  { %1967 = vpow2.f32 %v1576_v11  ;;  %v1577_v13 = vmul.f32 -1.442695, %v1110_v12 }
 0x64f   :  { %1969 = vpow2.f32 %v1577_v13  ;;  %v2007_v13 = vld [vmem:[#allocation5 + $0xa8] ss:$12 sps:$4 sm:$0xff]  }
 0x65a   :  { %v1968_v14 = vpop.eup %1967 }
 0x65b   :  { %v1104_v15 = vadd.f32 1.0, %v1968_v14  ;;  %v2008_v14 = vld [vmem:[#allocation5 + $0xb0] ss:$12 sps:$4 sm:$0xff]  }
 0x65c   :  { %v1970_v17 = vpop.eup %1969 }
 0x65d   :  { %1971 = vrcp.f32 %v1104_v15  ;;  %v1114_v16 = vadd.f32 1.0, %v1970_v17  ;;  %v2009_v15 = vld [vmem:[#allocation5 + $0x94] ss:$12 sps:$4 sm:$0xff]   ;;  %v2010_v17 = vld [vmem:[#allocation5 + $0x90] ss:$12 sps:$4 sm:$0xff]  }
 0x65f   :  { %1973 = vrcp.f32 %v1114_v16  ;;  %v2012_v16 = vld [vmem:[#allocation5 + $0x7c] ss:$12 sps:$4 sm:$0xff]  }
 0x66a   :  { %v1972_v21 = vpop.eup %1971 }
 0x66b   :  { %v1120_v24 = vmul.f32 %v1972_v21, %v1118_v20  ;;  %v2013_v20 = vld [vmem:[#allocation5 + $0x78] ss:$12 sps:$4 sm:$0xff]   ;;  %v2014_v21 = vld [vmem:[#allocation5 + $0x80] ss:$12 sps:$4 sm:$0xff]  }
 0x66c   :  { %v1974_v28 = vpop.eup %1973 }
 0x66d   :  { %v1121_v26 = vadd.f32 %v1120_v24, %v2304_v8  ;;  %v1123_v19 = vsub.f32 1.0, %v1974_v28  ;;  %v1128_v25 = vmul.f32 %v1974_v28, %v1126_v61  ;;  %v2015_v24 = vld [vmem:[#allocation5 + $0x64] ss:$12 sps:$4 sm:$0xff]   ;;  %v2018_v28 = vld [vmem:[#allocation5 + $0x4c] ss:$12 sps:$4 sm:$0xff]  }
 0x66e   :  { %v2020_v61 = vld [vmem:[#allocation5 + $0x50] ss:$12 sps:$4 sm:$0xff]  }
 0x66f   :  { %1975 = vtanh.f32 %v1121_v26  ;;  %v2017_v26 = vld [vmem:[#allocation5 + $0x68] ss:$12 sps:$4 sm:$0xff]  }
 0x67c   :  { %v1976_v31 = vpop.eup %1975 }
 0x67d   :  { %v1124_v32 = vmul.f32 %v1976_v31, %v1123_v19  ;;  %v2019_v19 = vld [vmem:[#allocation5 + $0x48] ss:$12 sps:$4 sm:$0xff]  }
 0x67e   :  { %v2021_v31 = vld [vmem:[#allocation5 + $0x34] ss:$12 sps:$4 sm:$0xff]  }
 0x67f   :  { %v2519_v34 = vadd.f32 %v1128_v25, %v1124_v32  ;;  %v2022_v32 = vld [vmem:[#allocation5 + $0x30] ss:$12 sps:$4 sm:$0xff]   ;;  %v2023_v25 = vld [vmem:[#allocation5 + $0x38] ss:$12 sps:$4 sm:$0xff]  }
 0x681   :  { %v1130_v27 = vpack.c.bf16 %v2519_v34, %v2519_v34  ;;  %v2525_v37 = vsel %vm1492_vm6, %v2475_v30, %v2519_v34  ;;  %v1244_v63 = vrot.slane %v2519_v34, 7  ;;  %v2024_v34 = vld [vmem:[#allocation5 + $0x1c] ss:$12 sps:$4 sm:$0xff]  }
 0x683   :  { %v1132_v40 = vrot.slane %v1130_v27, 2  ;;  %v2025_v27 = vld [vmem:[#allocation5 + $0x18] ss:$12 sps:$4 sm:$0xff]  }
 0x685   :  { %1167 = vmatmul.mubr.bf16.vlgmr.msra.gmra.mxu1 %v1132_v40  ;;  %1810 = vmatmul.mubr.bf16.vlgmr.msra.gmra.mxu0 %v1132_v40  ;;  %v2027_v40 = vld [vmem:[#allocation5 + $0x4] ss:$12 sps:$4 sm:$0xff]  }
 0x686   :  { %1255 = vmatpush1.bf16.msra.mxu1 %v2177_v35  ;;  %1814 = vmatpush3.bf16.msra.mxu0 %v2179_v36 }
 0x687   :  { %1256 = vmatprep.subr.bf16.mxu1 %v2181_v38  ;;  %1815 = vmatprep.subr.bf16.mxu0 %v2101_v1 }
 0x688   :  { %1286 = vmatprep.mubr.bf16.mxu1 %v2100_v0  ;;  %1829 = vmatprep.mubr.msk.bf16.mxu0 %vm2102_vm0, %v2101_v1 }
 0x68a   :  { %1257 = vmatpush1.bf16.msra.mxu1 %v2184_v41  ;;  %1816 = vmatpush3.bf16.msra.mxu0 %v2187_v42 }
 0x68b   :  { %1258 = vmatprep.subr.bf16.mxu1 %v2190_v43  ;;  %1817 = vmatprep.subr.bf16.mxu0 %v2101_v1 }
 0x68e   :  { %1259 = vmatpush1.bf16.msra.mxu1 %v2197_v45  ;;  %1818 = vmatpush3.bf16.msra.mxu0 %v2200_v46 }
 0x68f   :  { %1260 = vmatprep.subr.bf16.mxu1 %v2203_v47  ;;  %1819 = vmatprep.subr.bf16.mxu0 %v2101_v1 }
 0x692   :  { %1261 = vmatpush1.bf16.msra.mxu1 %v2207_v48  ;;  %1820 = vmatpush3.bf16.msra.mxu0 %v2210_v49 }
 0x693   :  { %1262 = vmatprep.subr.bf16.mxu1 %v2213_v50  ;;  %1821 = vmatprep.subr.bf16.mxu0 %v2101_v1 }
 0x696   :  { %1263 = vmatpush1.bf16.msra.mxu1 %v2217_v51  ;;  %1822 = vmatpush3.bf16.msra.mxu0 %v2220_v52 }
 0x697   :  { %1264 = vmatprep.subr.bf16.mxu1 %v2223_v53  ;;  %1823 = vmatprep.subr.bf16.mxu0 %v2101_v1 }
 0x69a   :  { %1265 = vmatpush1.bf16.msra.mxu1 %v2227_v54  ;;  %1824 = vmatpush3.bf16.msra.mxu0 %v2230_v55 }
 0x69b   :  { %1266 = vmatprep.subr.bf16.mxu1 %v2233_v56  ;;  %1825 = vmatprep.subr.bf16.mxu0 %v2101_v1 }
 0x69e   :  { %1267 = vmatpush1.bf16.msra.mxu1 %v2237_v57  ;;  %1826 = vmatpush3.bf16.msra.mxu0 %v2240_v58 }
 0x69f   :  { %1268 = vmatprep.subr.bf16.mxu1 %v2243_v59  ;;  %1827 = vmatprep.subr.bf16.mxu0 %v2101_v1 }
 0x6a2   :  { %1269 = vmatpush1.bf16.msra.mxu1 %v2247_v60  ;;  %1828 = vmatpush3.bf16.msra.mxu0 %v2255_v62 }
 0x6a3   :  { %1372 = vmatprep.subr.bf16.mxu1 %v2173_v33  ;;  %1833 = vmatprep.subr.bf16.mxu0 %v2101_v1 }
 0x745   :  { %v1168_v35 = vpop.f32.mrf.mxu1  ;;  %v1209_v36 = vpop.f32.mrf.mxu0 }
 0x746   :  { %v1169_v38 = vadd.f32 %v1168_v35, %v2309_v18  ;;  %v1210_v57 = vadd.f32 %v1209_v36, %v2321_v4  ;;  %v2028_v35 = vld [vmem:[#allocation5] ss:$12 sps:$4 sm:$0xff]   ;;  %v2029_v36 = vld [vmem:[#allocation5 + $0x8] ss:$12 sps:$4 sm:$0xff]  }
 0x747   :  { %v1170_v41 = vpop.f32.mrf.mxu1  ;;  %v1811_v42 = vpop.f32.mrf.mxu0 }
 0x748   :  { %v1216_v43 = vrot.slane %v1169_v38, 3  ;;  %v1171_v45 = vadd.f32 %v1170_v41, %v2313_v23  ;;  %v1236_v59 = vrot.slane %v1210_v57, 3 }
 0x749   :  { %v1172_v46 = vpop.f32.mrf.mxu1  ;;  %v1212_v47 = vpop.f32.mrf.mxu0 }
 0x74a   :  { %v1218_v48 = vadd.f32 %v1216_v43, %v2311_v22  ;;  %v1226_v52 = vrot.slane %v1171_v45, 3 }
 0x74b   :  { %v1173_v49 = vpop.f32.mrf.mxu1  ;;  %v1812_v50 = vpop.f32.mrf.mxu0 }
 0x74c   :  { %v1578_v51 = vmul.f32 -1.442695, %v1218_v48  ;;  %v1228_v33 = vadd.f32 %v1226_v52, %v2318_v39 }
 0x74e   :  { %1977 = vpow2.f32 %v1578_v51  ;;  %v1579_v53 = vmul.f32 -1.442695, %v1228_v33 }
 0x750   :  { %1979 = vpow2.f32 %v1579_v53 }
 0x75b   :  { %v1978_v54 = vpop.eup %1977 }
 0x75c   :  { %v1222_v55 = vadd.f32 1.0, %v1978_v54 }
 0x75d   :  { %v1980_v56 = vpop.eup %1979 }
 0x75e   :  { %1981 = vrcp.f32 %v1222_v55  ;;  %v1232_v58 = vadd.f32 1.0, %v1980_v56 }
 0x760   :  { %1983 = vrcp.f32 %v1232_v58 }
 0x76b   :  { %v1982_v60 = vpop.eup %1981 }
 0x76c   :  { %v1238_v62 = vmul.f32 %v1982_v60, %v1236_v59 }
 0x76d   :  { %v1984_v30 = vpop.eup %1983 }
 0x76e   :  { %v1239_v29 = vadd.f32 %v1238_v62, %v2304_v8  ;;  %v1241_v44 = vsub.f32 1.0, %v1984_v30  ;;  %v1246_v6 = vmul.f32 %v1984_v30, %v1244_v63 }
 0x770   :  { %1985 = vtanh.f32 %v1239_v29 }
 0x77d   :  { %v1986_v2 = vpop.eup %1985 }
 0x77e   :  { %v1242_v5 = vmul.f32 %v1986_v2, %v1241_v44 }
 0x780   :  { %v2569_v7 = vadd.f32 %v1246_v6, %v1242_v5 }
 0x782   :  { %v1248_v10 = vpack.c.bf16 %v2569_v7, %v2569_v7  ;;  %v2575_v11 = vsel %vm1494_vm7, %v2525_v37, %v2569_v7  ;;  %v2026_v37 = vld [vmem:[#allocation5 + $0x20] ss:$12 sps:$4 sm:$0xff]   ;;  %v1364_v2 = vrot.slane %v2569_v7, 7 }
 0x784   :  { %v1250_v9 = vshrl.u32 %v1248_v10, 16 }
 0x786   :  { %v1252_v12 = vrot.slane %v1250_v9, 2 }
 0x788   :  { %1287 = vmatmul.mubr.bf16.vlgmr.msra.gmra.mxu1 %v1252_v12  ;;  %1830 = vmatmul.mubr.bf16.vlgmr.msra.gmra.mxu0 %v1252_v12 }
 0x789   :  { %1373 = vmatpush1.bf16.msra.mxu1 %v2007_v13  ;;  %1834 = vmatpush3.bf16.msra.mxu0 %v2008_v14 }
 0x78a   :  { %1374 = vmatprep.subr.bf16.mxu1 %v2009_v15  ;;  %1835 = vmatprep.subr.bf16.mxu0 %v2101_v1 }
 0x78b   :  { %1404 = vmatprep.mubr.bf16.mxu1 %v2100_v0  ;;  %1849 = vmatprep.mubr.msk.bf16.mxu0 %vm2102_vm0, %v2101_v1  ;;  %v2016_v0 = vld [vmem:[#allocation5 + $0x60] ss:$12 sps:$4 sm:$0xff]  }
 0x78d   :  { %1375 = vmatpush1.bf16.msra.mxu1 %v2010_v17  ;;  %1836 = vmatpush3.bf16.msra.mxu0 %v2011_v3 }
 0x78e   :  { %1376 = vmatprep.subr.bf16.mxu1 %v2012_v16  ;;  %1837 = vmatprep.subr.bf16.mxu0 %v2101_v1 }
 0x791   :  { %1377 = vmatpush1.bf16.msra.mxu1 %v2013_v20  ;;  %1838 = vmatpush3.bf16.msra.mxu0 %v2014_v21 }
 0x792   :  { %1378 = vmatprep.subr.bf16.mxu1 %v2015_v24  ;;  %1839 = vmatprep.subr.bf16.mxu0 %v2101_v1 }
 0x795   :  { %1379 = vmatpush1.bf16.msra.mxu1 %v2016_v0  ;;  %1840 = vmatpush3.bf16.msra.mxu0 %v2017_v26 }
 0x796   :  { %1380 = vmatprep.subr.bf16.mxu1 %v2018_v28  ;;  %1841 = vmatprep.subr.bf16.mxu0 %v2101_v1 }
 0x799   :  { %1381 = vmatpush1.bf16.msra.mxu1 %v2019_v19  ;;  %1842 = vmatpush3.bf16.msra.mxu0 %v2020_v61 }
 0x79a   :  { %1382 = vmatprep.subr.bf16.mxu1 %v2021_v31  ;;  %1843 = vmatprep.subr.bf16.mxu0 %v2101_v1 }
 0x79d   :  { %1383 = vmatpush1.bf16.msra.mxu1 %v2022_v32  ;;  %1844 = vmatpush3.bf16.msra.mxu0 %v2023_v25 }
 0x79e   :  { %1384 = vmatprep.subr.bf16.mxu1 %v2024_v34  ;;  %1845 = vmatprep.subr.bf16.mxu0 %v2101_v1 }
 0x7a1   :  { %1385 = vmatpush1.bf16.msra.mxu1 %v2025_v27  ;;  %1846 = vmatpush3.bf16.msra.mxu0 %v2026_v37 }
 0x7a2   :  { %1386 = vmatprep.subr.bf16.mxu1 %v2027_v40  ;;  %1847 = vmatprep.subr.bf16.mxu0 %v2101_v1 }
 0x7a5   :  { %1387 = vmatpush1.bf16.msra.mxu1 %v2028_v35  ;;  %1848 = vmatpush3.bf16.msra.mxu0 %v2029_v36 }
 0x848   :  { %v1288_v38 = vpop.f32.mrf.mxu1  ;;  %v1329_v41 = vpop.f32.mrf.mxu0 }
 0x849   :  { %v1289_v42 = vadd.f32 %v1288_v38, %v2309_v18  ;;  %v1330_v58 = vadd.f32 %v1329_v41, %v2321_v4 }
 0x84a   :  { %v1290_v43 = vpop.f32.mrf.mxu1  ;;  %v1831_v45 = vpop.f32.mrf.mxu0 }
 0x84b   :  { %v1336_v46 = vrot.slane %v1289_v42, 2  ;;  %v1291_v47 = vadd.f32 %v1290_v43, %v2313_v23  ;;  %v1356_v60 = vrot.slane %v1330_v58, 2 }
 0x84c   :  { %v1292_v48 = vpop.f32.mrf.mxu1  ;;  %v1332_v49 = vpop.f32.mrf.mxu0 }
 0x84d   :  { %v1338_v50 = vadd.f32 %v1336_v46, %v2311_v22  ;;  %v1346_v33 = vrot.slane %v1291_v47, 2 }
 0x84e   :  { %v1293_v51 = vpop.f32.mrf.mxu1  ;;  %v1832_v52 = vpop.f32.mrf.mxu0 }
 0x84f   :  { %v1580_v1 = vmul.f32 -1.442695, %v1338_v50  ;;  %v1348_v53 = vadd.f32 %v1346_v33, %v2318_v39 }
 0x851   :  { %1987 = vpow2.f32 %v1580_v1  ;;  %v1581_v54 = vmul.f32 -1.442695, %v1348_v53 }
 0x853   :  { %1989 = vpow2.f32 %v1581_v54 }
 0x85e   :  { %v1988_v55 = vpop.eup %1987 }
 0x85f   :  { %v1342_v56 = vadd.f32 1.0, %v1988_v55 }
 0x860   :  { %v1990_v57 = vpop.eup %1989 }
 0x861   :  { %1991 = vrcp.f32 %v1342_v56  ;;  %v1352_v59 = vadd.f32 1.0, %v1990_v57 }
 0x863   :  { %1993 = vrcp.f32 %v1352_v59 }
 0x86e   :  { %v1992_v62 = vpop.eup %1991 }
 0x86f   :  { %v1358_v29 = vmul.f32 %v1992_v62, %v1356_v60 }
 0x870   :  { %v1994_v44 = vpop.eup %1993 }
 0x871   :  { %v1359_v30 = vadd.f32 %v1358_v29, %v2304_v8  ;;  %v1361_v63 = vsub.f32 1.0, %v1994_v44  ;;  %v1366_v10 = vmul.f32 %v1994_v44, %v1364_v2 }
 0x873   :  { %1995 = vtanh.f32 %v1359_v30 }
 0x880   :  { %v1996_v5 = vpop.eup %1995 }
 0x881   :  { %v1362_v6 = vmul.f32 %v1996_v5, %v1361_v63 }
 0x883   :  { %v1367_v9 = vadd.f32 %v1366_v10, %v1362_v6 }
 0x885   :  { %v1368_v12 = vpack.c.bf16 %v1367_v9, %v1367_v9  ;;  %v1497_v13 = vsel %vm1496_vm8, %v2575_v11, %v1367_v9  ;;  %v1482_v41 = vrot.slane %v1367_v9, 7 }
 0x887   :  { %v1370_v14 = vrot.slane %v1368_v12, 3 }
 0x889   :  { %1405 = vmatmul.mubr.bf16.vlgmr.msra.gmra.mxu1 %v1370_v14  ;;  %1850 = vmatmul.mubr.bf16.vlgmr.msra.gmra.mxu0 %v1370_v14 }
 0x949   :  { %v1406_v15 = vpop.f32.mrf.mxu1  ;;  %v1447_v17 = vpop.f32.mrf.mxu0 }
 0x94a   :  { %v1407_v3 = vadd.f32 %v1406_v15, %v2309_v18  ;;  %v1448_v27 = vadd.f32 %v1447_v17, %v2321_v4 }
 0x94b   :  { %v1408_v16 = vpop.f32.mrf.mxu1  ;;  %v1851_v20 = vpop.f32.mrf.mxu0 }
 0x94c   :  { %v1454_v21 = vrot.slane %v1407_v3, 1  ;;  %v1409_v7 = vadd.f32 %v1408_v16, %v2313_v23  ;;  %v1474_v37 = vrot.slane %v1448_v27, 1 }
 0x94d   :  { %v1410_v24 = vpop.f32.mrf.mxu1  ;;  %v1450_v0 = vpop.f32.mrf.mxu0 }
 0x94e   :  { %v1456_v26 = vadd.f32 %v1454_v21, %v2311_v22  ;;  %v1464_v11 = vrot.slane %v1409_v7, 1 }
 0x94f   :  { %v1411_v28 = vpop.f32.mrf.mxu1  ;;  %v1852_v19 = vpop.f32.mrf.mxu0 }
 0x950   :  { %v1582_v61 = vmul.f32 -1.442695, %v1456_v26  ;;  %v1466_v31 = vadd.f32 %v1464_v11, %v2318_v39 }
 0x952   :  { %1997 = vpow2.f32 %v1582_v61  ;;  %v1583_v32 = vmul.f32 -1.442695, %v1466_v31 }
 0x954   :  { %1999 = vpow2.f32 %v1583_v32 }
 0x95f   :  { %v1998_v25 = vpop.eup %1997 }
 0x960   :  { %v1460_v18 = vadd.f32 1.0, %v1998_v25 }
 0x961   :  { %v2000_v34 = vpop.eup %1999 }
 0x962   :  { %2001 = vrcp.f32 %v1460_v18  ;;  %v1470_v23 = vadd.f32 1.0, %v2000_v34 }
 0x964   :  { %2003 = vrcp.f32 %v1470_v23 }
 0x96f   :  { %v2002_v40 = vpop.eup %2001 }
 0x970   :  { %v1476_v35 = vmul.f32 %v2002_v40, %v1474_v37 }
 0x971   :  { %v2004_v36 = vpop.eup %2003 }
 0x972   :  { %v1477_v22 = vadd.f32 %v1476_v35, %v2304_v8  ;;  %v1479_v38 = vsub.f32 1.0, %v2004_v36  ;;  %v1484_v43 = vmul.f32 %v2004_v36, %v1482_v41 }
 0x974   :  { %2005 = vtanh.f32 %v1477_v22 }
 0x981   :  { %v2006_v39 = vpop.eup %2005 }
 0x982   :  { %v1480_v42 = vmul.f32 %v2006_v39, %v1479_v38 }
 0x984   :  { %v1485_v45 = vadd.f32 %v1484_v43, %v1480_v42 }
 0x986   :  { %v1499_v4 = vsel %vm1498_vm9, %v1497_v13, %v1485_v45 }
 0x987   :  { %1500 = vst [vmem:[#allocation7] sm:$0xff] %v1499_v4 }
 0x988   :  { %2081 = shalt.err (!%p2078_p0)
}
 0x989   :  { %1510 = dma.vmem_to_hbm [thread:$0]  %s1508_s5, 128, %s2611_s7, [#allocation4]  }
 0x98a   :  { %2094 = dma.done.wait [#allocation4], 128  }
 0x98b   :  { %2095 = vsyncadd [#allocation4], 4294967168 }
 0x98c   :  { %1514 = vsyncpa [#allocation3], 1 }
 0x98d   :  { %1515 = vsyncpa [#allocation6], 1 }
 0x98e   :  { %1516 = vsyncpa [#allocation4], 1 }

</bundles_post_ra>
